<compile_context>
chip_gen: v7x
topology: tpu7x:2x2x1
jax: 0.10.0
libtpu: 0.0.40
codegen_flags: <defaults>
</compile_context>

<pallas_src>
import jax
import jax.numpy as jnp
from jax import lax
from jax.experimental import pallas as pl
from jax.experimental.pallas import tpu as pltpu

EPS = 1e-5  # PyTorch BatchNorm2d default eps


# ------------------------------ Pallas kernel -------------------------------

def make_bottleneck_kernel(N, H, W, Ho, Wo, stride, Cin, P, Cout, has_ds):
    """Build the fused bottleneck kernel for one static configuration."""
    S_in, S_out = H * W, Ho * Wo
    NS_in, NS_out = N * S_in, N * S_out
    strided = stride > 1

    def bn(y, g, b, relu):
        # Single-pass batch statistics over every lane (batch x spatial), biased
        # variance (PyTorch BN with track_running_stats=False), fused scale/shift.
        cnt = jnp.float32(y.shape[1])
        s = jnp.sum(y, axis=1, keepdims=True)
        sq = jnp.sum(y * y, axis=1, keepdims=True)
        mean = s / cnt
        var = jnp.maximum(sq / cnt - mean * mean, 0.0)
        scale = g * lax.rsqrt(var + EPS)
        shift = b - mean * scale
        out = y * scale + shift
        return jnp.maximum(out, 0.0) if relu else out

    def kernel(*refs):
        *in_refs, o_ref = refs
        it = iter(in_refs)
        x_ref = next(it)          # (Cin, NS_in) f32 lane slab
        masks_ref = next(it)      # (9, NS_in) f32 tap validity masks
        w1_ref, g1_ref, b1_ref = next(it), next(it), next(it)
        w2_ref, g2_ref, b2_ref = next(it), next(it), next(it)
        w3_ref, g3_ref, b3_ref = next(it), next(it), next(it)
        if has_ds:
            wd_ref, gd_ref, bd_ref = next(it), next(it), next(it)
        if strided:
            sel_ref = next(it)    # (NS_in, NS_out) bf16 block-diag subsample
        if has_ds and strided:
            xid_ref = next(it)    # (Cin, NS_out) f32 strided identity slab

        x = x_ref[...]                                            # (Cin, NS_in)

        # ---- conv1 (1x1) + bn1 + relu: one batched MXU matmul -------------
        y1 = bn(jnp.dot(w1_ref[...], x.astype(jnp.bfloat16),
                        preferred_element_type=jnp.float32),
                g1_ref[...], b1_ref[...], relu=True)              # (P, NS_in)

        # ---- conv2 (3x3, pad=1): 9 lane rolls + masks, one K=9P matmul ----
        taps = []
        for ky in range(3):
            for kx in range(3):
                t = ky * 3 + kx
                off = (ky - 1) * W + (kx - 1)
                shifted = y1 if off == 0 else pltpu.roll(y1, (-off) % NS_in,
                                                         axis=1)
                taps.append(shifted * masks_ref[t:t + 1, :])
        stacked = jnp.concatenate(taps, axis=0).astype(jnp.bfloat16)  # (9P, NS_in)
        y2 = jnp.dot(w2_ref[...], stacked,
                     preferred_element_type=jnp.float32)          # (P, NS_in)

        # Apply the stride ONCE, as a single subsample matmul (before BN2 so
        # the batch statistics match the strided-conv reference).
        if strided:
            y2 = jnp.dot(y2.astype(jnp.bfloat16), sel_ref[...],
                         preferred_element_type=jnp.float32)      # (P, NS_out)
        out2 = bn(y2, g2_ref[...], b2_ref[...], relu=True)

        # ---- conv3 (1x1) + bn3, downsample + bn_d, residual add, relu -----
        y3 = bn(jnp.dot(w3_ref[...], out2.astype(jnp.bfloat16),
                        preferred_element_type=jnp.float32),
                g3_ref[...], b3_ref[...], relu=False)             # (Cout, NS_out)
        if has_ds:
            ident = xid_ref[...] if strided else x                # (Cin, NS_out)
            yd = bn(jnp.dot(wd_ref[...], ident.astype(jnp.bfloat16),
                            preferred_element_type=jnp.float32),
                    gd_ref[...], bd_ref[...], relu=False)
            res = jnp.maximum(y3 + yd, 0.0)
        else:
            res = jnp.maximum(y3 + x, 0.0)

        o_ref[...] = res           # single lane-dense (Cout, NS_out) store

    return kernel


# ------------------------------- wrapper (JAX) -------------------------------

def _tap_masks(N, H, W):
    """(9, N*H*W) f32: 1 where the (ky,kx) tap reads an in-bounds pixel."""
    s = jnp.arange(H * W, dtype=jnp.int32)
    y, x = s // W, s % W
    rows = []
    for ky in range(3):
        for kx in range(3):
            dy, dx = ky - 1, kx - 1
            ok = ((y + dy >= 0) & (y + dy < H) & (x + dx >= 0) & (x + dx < W))
            rows.append(jnp.tile(ok.astype(jnp.float32), N))
    return jnp.stack(rows, axis=0)


def _subsample_sel(N, H, W, stride):
    """(N*H*W, N*Ho*Wo) bf16 block-diag 0/1 strided-subsample selection."""
    Ho, Wo = (H - 1) // stride + 1, (W - 1) // stride + 1
    S_in, S_out = H * W, Ho * Wo
    m = jnp.arange(S_out, dtype=jnp.int32)
    src = (m // Wo) * stride * W + (m % Wo) * stride
    blk = (jnp.arange(S_in, dtype=jnp.int32)[:, None]
           == src[None, :]).astype(jnp.bfloat16)
    return jnp.kron(jnp.eye(N, dtype=jnp.bfloat16), blk)


def prepare_params(w1_oihw, w2_oihw, w3_oihw, wd_oihw, bn_p):
    """PyTorch OIHW weights -> the kernel's bf16 matmul layouts + BN columns."""
    P = w1_oihw.shape[0]
    bf = lambda a: a.astype(jnp.bfloat16)
    col = lambda v: v.reshape(-1, 1).astype(jnp.float32)
    params = {
        "w1": bf(w1_oihw[:, :, 0, 0]),                                   # (P, Cin)
        "w2": bf(jnp.transpose(w2_oihw, (0, 2, 3, 1)).reshape(P, 9 * P)),  # (P, 9P)
        "w3": bf(w3_oihw[:, :, 0, 0]),                                   # (Cout, P)
        "g1": col(bn_p["g1"]), "b1": col(bn_p["b1"]),
        "g2": col(bn_p["g2"]), "b2": col(bn_p["b2"]),
        "g3": col(bn_p["g3"]), "b3": col(bn_p["b3"]),
    }
    if wd_oihw is not None:
        params["wd"] = bf(wd_oihw[:, :, 0, 0])                           # (Cout, Cin)
        params["gd"] = col(bn_p["gd"])
        params["bd"] = col(bn_p["bd"])
    return params


def cifar_bottleneck_forward(x_nchw, params, stride):
    """Fused Pallas forward of CIFAR_Bottleneck. Input/output are NCHW."""
    N, Cin, H, W = x_nchw.shape
    P = params["w1"].shape[0]
    Cout = params["w3"].shape[0]
    Ho = (H - 1) // stride + 1
    Wo = (W - 1) // stride + 1
    S_in, S_out = H * W, Ho * Wo
    has_ds = (stride != 1) or (Cin != Cout)
    strided = stride > 1

    # Channels on sublanes, batch*spatial on lanes (lane-dense slabs).
    x_slab = jnp.transpose(x_nchw, (1, 0, 2, 3)).reshape(Cin, N * S_in)
    x_slab = x_slab.astype(jnp.float32)

    args = [x_slab, _tap_masks(N, H, W),
            params["w1"], params["g1"], params["b1"],
            params["w2"], params["g2"], params["b2"],
            params["w3"], params["g3"], params["b3"]]
    if has_ds:
        args += [params["wd"], params["gd"], params["bd"]]
    if strided:
        args.append(_subsample_sel(N, H, W, stride))
    if has_ds and strided:
        xs = x_nchw[:, :, ::stride, ::stride]
        args.append(jnp.transpose(xs, (1, 0, 2, 3))
                    .reshape(Cin, N * S_out).astype(jnp.float32))

    flops = 2 * (P * Cin * N * S_in              # conv1
                 + P * 9 * P * N * S_in          # conv2 (full res, K = 9P)
                 + (P * N * S_in * N * S_out if strided else 0)  # subsample
                 + Cout * P * N * S_out          # conv3
                 + (Cout * Cin * N * S_out if has_ds else 0))    # downsample
    bytes_accessed = (sum(int(a.size) * a.dtype.itemsize for a in args)
                      + Cout * N * S_out * 4)
    transcendentals = 2 * P + Cout + (Cout if has_ds else 0)     # rsqrt per channel

    out = pl.pallas_call(
        make_bottleneck_kernel(N, H, W, Ho, Wo, stride, Cin, P, Cout, has_ds),
        out_shape=jax.ShapeDtypeStruct((Cout, N * S_out), jnp.float32),
        in_specs=[pl.BlockSpec(memory_space=pltpu.MemorySpace.VMEM)] * len(args),
        out_specs=pl.BlockSpec(memory_space=pltpu.MemorySpace.VMEM),
        compiler_params=pltpu.CompilerParams(vmem_limit_bytes=32 * 1024 * 1024),
        cost_estimate=pl.CostEstimate(flops=flops,
                                      transcendentals=transcendentals,
                                      bytes_accessed=bytes_accessed),
    )(*args)
    # Layout plumbing back to NCHW happens outside the kernel (cheap XLA ops).
    return out.reshape(Cout, N, Ho, Wo).transpose(1, 0, 2, 3)


# ---------------------------- pure-JAX reference -----------------------------

def _ref_conv(x, w_oihw, stride, pad):
    return lax.conv_general_dilated(
        x, w_oihw, (stride, stride), [(pad, pad), (pad, pad)],
        dimension_numbers=("NCHW", "OIHW", "NCHW"))


def _ref_bn(x, g, b):
    mean = x.mean(axis=(0, 2, 3), keepdims=True)
    var = ((x - mean) ** 2).mean(axis=(0, 2, 3), keepdims=True)
    return (x - mean) / jnp.sqrt(var + EPS) * g.reshape(1, -1, 1, 1) \
        + b.reshape(1, -1, 1, 1)


def cifar_bottleneck_reference(x, w1, w2, w3, wd, bn_p, stride):
    out = jax.nn.relu(_ref_bn(_ref_conv(x, w1, 1, 0), bn_p["g1"], bn_p["b1"]))
    out = jax.nn.relu(_ref_bn(_ref_conv(out, w2, stride, 1), bn_p["g2"], bn_p["b2"]))
    out = _ref_bn(_ref_conv(out, w3, 1, 0), bn_p["g3"], bn_p["b3"])
    if wd is not None:
        identity = _ref_bn(_ref_conv(x, wd, stride, 0), bn_p["gd"], bn_p["bd"])
    else:
        identity = x
    return jax.nn.relu(out + identity)


# ---------------------------------- main -------------------------------------

def _run_case(key, N, in_planes, planes, stride, H, W):
    expansion = 4
    out_planes = expansion * planes
    has_ds = (stride != 1) or (in_planes != out_planes)
    ks = jax.random.split(key, 14)

    w1 = 0.1 * jax.random.normal(ks[0], (planes, in_planes, 1, 1), jnp.float32)
    w2 = 0.1 * jax.random.normal(ks[1], (planes, planes, 3, 3), jnp.float32)
    w3 = 0.1 * jax.random.normal(ks[2], (out_planes, planes, 1, 1), jnp.float32)
    wd = (0.1 * jax.random.normal(ks[3], (out_planes, in_planes, 1, 1), jnp.float32)
          if has_ds else None)

    bn_p = {
        "g1": 1.0 + 0.1 * jax.random.normal(ks[4], (planes,), jnp.float32),
        "b1": 0.1 * jax.random.normal(ks[5], (planes,), jnp.float32),
        "g2": 1.0 + 0.1 * jax.random.normal(ks[6], (planes,), jnp.float32),
        "b2": 0.1 * jax.random.normal(ks[7], (planes,), jnp.float32),
        "g3": 1.0 + 0.1 * jax.random.normal(ks[8], (out_planes,), jnp.float32),
        "b3": 0.1 * jax.random.normal(ks[9], (out_planes,), jnp.float32),
    }
    if has_ds:
        bn_p["gd"] = 1.0 + 0.1 * jax.random.normal(ks[10], (out_planes,), jnp.float32)
        bn_p["bd"] = 0.1 * jax.random.normal(ks[11], (out_planes,), jnp.float32)

    x = jax.random.normal(ks[12], (N, in_planes, H, W), jnp.float32)

    params = prepare_params(w1, w2, w3, wd, bn_p)
    out = jax.block_until_ready(cifar_bottleneck_forward(x, params, stride))
    ref = jax.block_until_ready(
        cifar_bottleneck_reference(x, w1, w2, w3, wd, bn_p, stride))

    Ho = (H - 1) // stride + 1
    Wo = (W - 1) // stride + 1
    assert out.shape == (N, out_planes, Ho, Wo), out.shape
    # bf16 matmul operands (f32 accumulation) => loosened tolerance vs f32 ref.
    err_max = float(jnp.abs(out - ref).max())
    err_rms = float(jnp.sqrt(jnp.mean((out - ref) ** 2)))
    assert err_max < 2e-1, ("max abs err", err_max)
    assert err_rms < 5e-2, ("rms err", err_rms)
    return err_max


if __name__ == "__main__":
    key = jax.random.PRNGKey(0)
    k1, k2 = jax.random.split(key)
    # Downsample branch: stride=2, in_planes != 4*planes (matches original config).
    _run_case(k1, N=2, in_planes=16, planes=8, stride=2, H=16, W=16)
    # Identity branch: stride=1, in_planes == 4*planes.
    _run_case(k2, N=2, in_planes=32, planes=8, stride=1, H=16, W=16)
    print("KERNEL_OK")
</pallas_src>

<mosaic_0001>
module attributes {stable_mosaic.version = 11 : i64} {
  func.func @kernel(%arg0: memref<16x512xf32, #tpu.memory_space<vmem>>, %arg1: memref<9x512xf32, #tpu.memory_space<vmem>>, %arg2: memref<8x16xbf16, #tpu.memory_space<vmem>>, %arg3: memref<8x1xf32, #tpu.memory_space<vmem>>, %arg4: memref<8x1xf32, #tpu.memory_space<vmem>>, %arg5: memref<8x72xbf16, #tpu.memory_space<vmem>>, %arg6: memref<8x1xf32, #tpu.memory_space<vmem>>, %arg7: memref<8x1xf32, #tpu.memory_space<vmem>>, %arg8: memref<32x8xbf16, #tpu.memory_space<vmem>>, %arg9: memref<32x1xf32, #tpu.memory_space<vmem>>, %arg10: memref<32x1xf32, #tpu.memory_space<vmem>>, %arg11: memref<32x16xbf16, #tpu.memory_space<vmem>>, %arg12: memref<32x1xf32, #tpu.memory_space<vmem>>, %arg13: memref<32x1xf32, #tpu.memory_space<vmem>>, %arg14: memref<512x128xbf16, #tpu.memory_space<vmem>>, %arg15: memref<16x128xf32, #tpu.memory_space<vmem>>, %arg16: memref<32x128xf32, #tpu.memory_space<vmem>>) attributes {dimension_semantics = [], scalar_prefetch = 0 : i64, scratch_operands = 0 : i64, tpu.core_type = #tpu.core_type<tc>} {
    %c0 = arith.constant 0 : index
    %c0_0 = arith.constant 0 : index
    %0 = vector.load %arg0[%c0, %c0_0] : memref<16x512xf32, #tpu.memory_space<vmem>>, vector<16x512xf32>
    %c0_1 = arith.constant 0 : index
    %c0_2 = arith.constant 0 : index
    %1 = vector.load %arg2[%c0_1, %c0_2] : memref<8x16xbf16, #tpu.memory_space<vmem>>, vector<8x16xbf16>
    %2 = arith.truncf %0 : vector<16x512xf32> to vector<16x512xbf16>
    %cst = arith.constant dense<0.000000e+00> : vector<8x512xf32>
    %3 = tpu.matmul %1, %2, %cst {dimension_numbers = #tpu.dot_dimension_numbers<[1], [0], [0], [1], [0, 0, 1, 1], [], []>} : vector<8x16xbf16>, vector<16x512xbf16>, vector<8x512xf32> -> vector<8x512xf32>
    %c0_3 = arith.constant 0 : index
    %c0_4 = arith.constant 0 : index
    %4 = vector.load %arg3[%c0_3, %c0_4] : memref<8x1xf32, #tpu.memory_space<vmem>>, vector<8x1xf32>
    %c0_5 = arith.constant 0 : index
    %c0_6 = arith.constant 0 : index
    %5 = vector.load %arg4[%c0_5, %c0_6] : memref<8x1xf32, #tpu.memory_space<vmem>>, vector<8x1xf32>
    %cst_7 = arith.constant dense<0.000000e+00> : vector<8xf32>
    %6 = vector.multi_reduction <add>, %3, %cst_7 [1] : vector<8x512xf32> to vector<8xf32>
    %7 = vector.shape_cast %6 : vector<8xf32> to vector<8x1xf32>
    %8 = arith.mulf %3, %3 : vector<8x512xf32>
    %cst_8 = arith.constant dense<0.000000e+00> : vector<8xf32>
    %9 = vector.multi_reduction <add>, %8, %cst_8 [1] : vector<8x512xf32> to vector<8xf32>
    %10 = vector.shape_cast %9 : vector<8xf32> to vector<8x1xf32>
    %cst_9 = arith.constant 5.120000e+02 : f32
    %11 = vector.broadcast %cst_9 : f32 to vector<8x1xf32>
    %12 = arith.divf %7, %11 : vector<8x1xf32>
    %cst_10 = arith.constant 5.120000e+02 : f32
    %13 = vector.broadcast %cst_10 : f32 to vector<8x1xf32>
    %14 = arith.divf %10, %13 : vector<8x1xf32>
    %15 = arith.mulf %12, %12 : vector<8x1xf32>
    %16 = arith.subf %14, %15 : vector<8x1xf32>
    %cst_11 = arith.constant 0.000000e+00 : f32
    %17 = vector.broadcast %cst_11 : f32 to vector<8x1xf32>
    %18 = arith.maximumf %16, %17 : vector<8x1xf32>
    %cst_12 = arith.constant 9.99999974E-6 : f32
    %19 = vector.broadcast %cst_12 : f32 to vector<8x1xf32>
    %20 = arith.addf %18, %19 : vector<8x1xf32>
    %21 = math.rsqrt %20 : vector<8x1xf32>
    %22 = arith.mulf %4, %21 : vector<8x1xf32>
    %23 = arith.mulf %12, %22 : vector<8x1xf32>
    %24 = arith.subf %5, %23 : vector<8x1xf32>
    %25 = vector.broadcast %22 : vector<8x1xf32> to vector<8x512xf32>
    %26 = arith.mulf %3, %25 : vector<8x512xf32>
    %27 = vector.broadcast %24 : vector<8x1xf32> to vector<8x512xf32>
    %28 = arith.addf %26, %27 : vector<8x512xf32>
    %cst_13 = arith.constant 0.000000e+00 : f32
    %29 = vector.broadcast %cst_13 : f32 to vector<8x512xf32>
    %30 = arith.maximumf %28, %29 : vector<8x512xf32>
    %c17_i32 = arith.constant 17 : i32
    %31 = tpu.dynamic_rotate %30 by %c17_i32 dim 1 : vector<8x512xf32>, i32 -> vector<8x512xf32>
    %c0_14 = arith.constant 0 : index
    %c0_15 = arith.constant 0 : index
    %32 = vector.load %arg1[%c0_14, %c0_15] : memref<9x512xf32, #tpu.memory_space<vmem>>, vector<1x512xf32>
    %33 = vector.broadcast %32 : vector<1x512xf32> to vector<8x512xf32>
    %34 = arith.mulf %31, %33 : vector<8x512xf32>
    %c16_i32 = arith.constant 16 : i32
    %35 = tpu.dynamic_rotate %30 by %c16_i32 dim 1 : vector<8x512xf32>, i32 -> vector<8x512xf32>
    %c1 = arith.constant 1 : index
    %c0_16 = arith.constant 0 : index
    %36 = vector.load %arg1[%c1, %c0_16] : memref<9x512xf32, #tpu.memory_space<vmem>>, vector<1x512xf32>
    %37 = vector.broadcast %36 : vector<1x512xf32> to vector<8x512xf32>
    %38 = arith.mulf %35, %37 : vector<8x512xf32>
    %c15_i32 = arith.constant 15 : i32
    %39 = tpu.dynamic_rotate %30 by %c15_i32 dim 1 : vector<8x512xf32>, i32 -> vector<8x512xf32>
    %c2 = arith.constant 2 : index
    %c0_17 = arith.constant 0 : index
    %40 = vector.load %arg1[%c2, %c0_17] : memref<9x512xf32, #tpu.memory_space<vmem>>, vector<1x512xf32>
    %41 = vector.broadcast %40 : vector<1x512xf32> to vector<8x512xf32>
    %42 = arith.mulf %39, %41 : vector<8x512xf32>
    %c1_i32 = arith.constant 1 : i32
    %43 = tpu.dynamic_rotate %30 by %c1_i32 dim 1 : vector<8x512xf32>, i32 -> vector<8x512xf32>
    %c3 = arith.constant 3 : index
    %c0_18 = arith.constant 0 : index
    %44 = vector.load %arg1[%c3, %c0_18] : memref<9x512xf32, #tpu.memory_space<vmem>>, vector<1x512xf32>
    %45 = vector.broadcast %44 : vector<1x512xf32> to vector<8x512xf32>
    %46 = arith.mulf %43, %45 : vector<8x512xf32>
    %c4 = arith.constant 4 : index
    %c0_19 = arith.constant 0 : index
    %47 = vector.load %arg1[%c4, %c0_19] : memref<9x512xf32, #tpu.memory_space<vmem>>, vector<1x512xf32>
    %48 = vector.broadcast %47 : vector<1x512xf32> to vector<8x512xf32>
    %49 = arith.mulf %30, %48 : vector<8x512xf32>
    %c511_i32 = arith.constant 511 : i32
    %50 = tpu.dynamic_rotate %30 by %c511_i32 dim 1 : vector<8x512xf32>, i32 -> vector<8x512xf32>
    %c5 = arith.constant 5 : index
    %c0_20 = arith.constant 0 : index
    %51 = vector.load %arg1[%c5, %c0_20] : memref<9x512xf32, #tpu.memory_space<vmem>>, vector<1x512xf32>
    %52 = vector.broadcast %51 : vector<1x512xf32> to vector<8x512xf32>
    %53 = arith.mulf %50, %52 : vector<8x512xf32>
    %c497_i32 = arith.constant 497 : i32
    %54 = tpu.dynamic_rotate %30 by %c497_i32 dim 1 : vector<8x512xf32>, i32 -> vector<8x512xf32>
    %c6 = arith.constant 6 : index
    %c0_21 = arith.constant 0 : index
    %55 = vector.load %arg1[%c6, %c0_21] : memref<9x512xf32, #tpu.memory_space<vmem>>, vector<1x512xf32>
    %56 = vector.broadcast %55 : vector<1x512xf32> to vector<8x512xf32>
    %57 = arith.mulf %54, %56 : vector<8x512xf32>
    %c496_i32 = arith.constant 496 : i32
    %58 = tpu.dynamic_rotate %30 by %c496_i32 dim 1 : vector<8x512xf32>, i32 -> vector<8x512xf32>
    %c7 = arith.constant 7 : index
    %c0_22 = arith.constant 0 : index
    %59 = vector.load %arg1[%c7, %c0_22] : memref<9x512xf32, #tpu.memory_space<vmem>>, vector<1x512xf32>
    %60 = vector.broadcast %59 : vector<1x512xf32> to vector<8x512xf32>
    %61 = arith.mulf %58, %60 : vector<8x512xf32>
    %c495_i32 = arith.constant 495 : i32
    %62 = tpu.dynamic_rotate %30 by %c495_i32 dim 1 : vector<8x512xf32>, i32 -> vector<8x512xf32>
    %c8 = arith.constant 8 : index
    %c0_23 = arith.constant 0 : index
    %63 = vector.load %arg1[%c8, %c0_23] : memref<9x512xf32, #tpu.memory_space<vmem>>, vector<1x512xf32>
    %64 = vector.broadcast %63 : vector<1x512xf32> to vector<8x512xf32>
    %65 = arith.mulf %62, %64 : vector<8x512xf32>
    %66 = tpu.concatenate %34, %38, %42, %46, %49, %53, %57, %61, %65 in 0 : vector<8x512xf32>, vector<8x512xf32>, vector<8x512xf32>, vector<8x512xf32>, vector<8x512xf32>, vector<8x512xf32>, vector<8x512xf32>, vector<8x512xf32>, vector<8x512xf32> -> vector<72x512xf32>
    %67 = arith.truncf %66 : vector<72x512xf32> to vector<72x512xbf16>
    %c0_24 = arith.constant 0 : index
    %c0_25 = arith.constant 0 : index
    %68 = vector.load %arg5[%c0_24, %c0_25] : memref<8x72xbf16, #tpu.memory_space<vmem>>, vector<8x72xbf16>
    %cst_26 = arith.constant dense<0.000000e+00> : vector<8x512xf32>
    %69 = tpu.matmul %68, %67, %cst_26 {dimension_numbers = #tpu.dot_dimension_numbers<[1], [0], [0], [1], [0, 0, 1, 1], [], []>} : vector<8x72xbf16>, vector<72x512xbf16>, vector<8x512xf32> -> vector<8x512xf32>
    %70 = arith.truncf %69 : vector<8x512xf32> to vector<8x512xbf16>
    %c0_27 = arith.constant 0 : index
    %c0_28 = arith.constant 0 : index
    %71 = vector.load %arg14[%c0_27, %c0_28] : memref<512x128xbf16, #tpu.memory_space<vmem>>, vector<512x128xbf16>
    %cst_29 = arith.constant dense<0.000000e+00> : vector<8x128xf32>
    %72 = tpu.matmul %70, %71, %cst_29 {dimension_numbers = #tpu.dot_dimension_numbers<[1], [0], [0], [1], [0, 0, 1, 1], [], []>} : vector<8x512xbf16>, vector<512x128xbf16>, vector<8x128xf32> -> vector<8x128xf32>
    %c0_30 = arith.constant 0 : index
    %c0_31 = arith.constant 0 : index
    %73 = vector.load %arg6[%c0_30, %c0_31] : memref<8x1xf32, #tpu.memory_space<vmem>>, vector<8x1xf32>
    %c0_32 = arith.constant 0 : index
    %c0_33 = arith.constant 0 : index
    %74 = vector.load %arg7[%c0_32, %c0_33] : memref<8x1xf32, #tpu.memory_space<vmem>>, vector<8x1xf32>
    %cst_34 = arith.constant dense<0.000000e+00> : vector<8xf32>
    %75 = vector.multi_reduction <add>, %72, %cst_34 [1] : vector<8x128xf32> to vector<8xf32>
    %76 = vector.shape_cast %75 : vector<8xf32> to vector<8x1xf32>
    %77 = arith.mulf %72, %72 : vector<8x128xf32>
    %cst_35 = arith.constant dense<0.000000e+00> : vector<8xf32>
    %78 = vector.multi_reduction <add>, %77, %cst_35 [1] : vector<8x128xf32> to vector<8xf32>
    %79 = vector.shape_cast %78 : vector<8xf32> to vector<8x1xf32>
    %cst_36 = arith.constant 1.280000e+02 : f32
    %80 = vector.broadcast %cst_36 : f32 to vector<8x1xf32>
    %81 = arith.divf %76, %80 : vector<8x1xf32>
    %cst_37 = arith.constant 1.280000e+02 : f32
    %82 = vector.broadcast %cst_37 : f32 to vector<8x1xf32>
    %83 = arith.divf %79, %82 : vector<8x1xf32>
    %84 = arith.mulf %81, %81 : vector<8x1xf32>
    %85 = arith.subf %83, %84 : vector<8x1xf32>
    %cst_38 = arith.constant 0.000000e+00 : f32
    %86 = vector.broadcast %cst_38 : f32 to vector<8x1xf32>
    %87 = arith.maximumf %85, %86 : vector<8x1xf32>
    %cst_39 = arith.constant 9.99999974E-6 : f32
    %88 = vector.broadcast %cst_39 : f32 to vector<8x1xf32>
    %89 = arith.addf %87, %88 : vector<8x1xf32>
    %90 = math.rsqrt %89 : vector<8x1xf32>
    %91 = arith.mulf %73, %90 : vector<8x1xf32>
    %92 = arith.mulf %81, %91 : vector<8x1xf32>
    %93 = arith.subf %74, %92 : vector<8x1xf32>
    %94 = vector.broadcast %91 : vector<8x1xf32> to vector<8x128xf32>
    %95 = arith.mulf %72, %94 : vector<8x128xf32>
    %96 = vector.broadcast %93 : vector<8x1xf32> to vector<8x128xf32>
    %97 = arith.addf %95, %96 : vector<8x128xf32>
    %cst_40 = arith.constant 0.000000e+00 : f32
    %98 = vector.broadcast %cst_40 : f32 to vector<8x128xf32>
    %99 = arith.maximumf %97, %98 : vector<8x128xf32>
    %c0_41 = arith.constant 0 : index
    %c0_42 = arith.constant 0 : index
    %100 = vector.load %arg8[%c0_41, %c0_42] : memref<32x8xbf16, #tpu.memory_space<vmem>>, vector<32x8xbf16>
    %101 = arith.truncf %99 : vector<8x128xf32> to vector<8x128xbf16>
    %cst_43 = arith.constant dense<0.000000e+00> : vector<32x128xf32>
    %102 = tpu.matmul %100, %101, %cst_43 {dimension_numbers = #tpu.dot_dimension_numbers<[1], [0], [0], [1], [0, 0, 1, 1], [], []>} : vector<32x8xbf16>, vector<8x128xbf16>, vector<32x128xf32> -> vector<32x128xf32>
    %c0_44 = arith.constant 0 : index
    %c0_45 = arith.constant 0 : index
    %103 = vector.load %arg9[%c0_44, %c0_45] : memref<32x1xf32, #tpu.memory_space<vmem>>, vector<32x1xf32>
    %c0_46 = arith.constant 0 : index
    %c0_47 = arith.constant 0 : index
    %104 = vector.load %arg10[%c0_46, %c0_47] : memref<32x1xf32, #tpu.memory_space<vmem>>, vector<32x1xf32>
    %cst_48 = arith.constant dense<0.000000e+00> : vector<32xf32>
    %105 = vector.multi_reduction <add>, %102, %cst_48 [1] : vector<32x128xf32> to vector<32xf32>
    %106 = vector.shape_cast %105 : vector<32xf32> to vector<32x1xf32>
    %107 = arith.mulf %102, %102 : vector<32x128xf32>
    %cst_49 = arith.constant dense<0.000000e+00> : vector<32xf32>
    %108 = vector.multi_reduction <add>, %107, %cst_49 [1] : vector<32x128xf32> to vector<32xf32>
    %109 = vector.shape_cast %108 : vector<32xf32> to vector<32x1xf32>
    %cst_50 = arith.constant 1.280000e+02 : f32
    %110 = vector.broadcast %cst_50 : f32 to vector<32x1xf32>
    %111 = arith.divf %106, %110 : vector<32x1xf32>
    %cst_51 = arith.constant 1.280000e+02 : f32
    %112 = vector.broadcast %cst_51 : f32 to vector<32x1xf32>
    %113 = arith.divf %109, %112 : vector<32x1xf32>
    %114 = arith.mulf %111, %111 : vector<32x1xf32>
    %115 = arith.subf %113, %114 : vector<32x1xf32>
    %cst_52 = arith.constant 0.000000e+00 : f32
    %116 = vector.broadcast %cst_52 : f32 to vector<32x1xf32>
    %117 = arith.maximumf %115, %116 : vector<32x1xf32>
    %cst_53 = arith.constant 9.99999974E-6 : f32
    %118 = vector.broadcast %cst_53 : f32 to vector<32x1xf32>
    %119 = arith.addf %117, %118 : vector<32x1xf32>
    %120 = math.rsqrt %119 : vector<32x1xf32>
    %121 = arith.mulf %103, %120 : vector<32x1xf32>
    %122 = arith.mulf %111, %121 : vector<32x1xf32>
    %123 = arith.subf %104, %122 : vector<32x1xf32>
    %124 = vector.broadcast %121 : vector<32x1xf32> to vector<32x128xf32>
    %125 = arith.mulf %102, %124 : vector<32x128xf32>
    %126 = vector.broadcast %123 : vector<32x1xf32> to vector<32x128xf32>
    %127 = arith.addf %125, %126 : vector<32x128xf32>
    %c0_54 = arith.constant 0 : index
    %c0_55 = arith.constant 0 : index
    %128 = vector.load %arg15[%c0_54, %c0_55] : memref<16x128xf32, #tpu.memory_space<vmem>>, vector<16x128xf32>
    %c0_56 = arith.constant 0 : index
    %c0_57 = arith.constant 0 : index
    %129 = vector.load %arg11[%c0_56, %c0_57] : memref<32x16xbf16, #tpu.memory_space<vmem>>, vector<32x16xbf16>
    %130 = arith.truncf %128 : vector<16x128xf32> to vector<16x128xbf16>
    %cst_58 = arith.constant dense<0.000000e+00> : vector<32x128xf32>
    %131 = tpu.matmul %129, %130, %cst_58 {dimension_numbers = #tpu.dot_dimension_numbers<[1], [0], [0], [1], [0, 0, 1, 1], [], []>} : vector<32x16xbf16>, vector<16x128xbf16>, vector<32x128xf32> -> vector<32x128xf32>
    %c0_59 = arith.constant 0 : index
    %c0_60 = arith.constant 0 : index
    %132 = vector.load %arg12[%c0_59, %c0_60] : memref<32x1xf32, #tpu.memory_space<vmem>>, vector<32x1xf32>
    %c0_61 = arith.constant 0 : index
    %c0_62 = arith.constant 0 : index
    %133 = vector.load %arg13[%c0_61, %c0_62] : memref<32x1xf32, #tpu.memory_space<vmem>>, vector<32x1xf32>
    %cst_63 = arith.constant dense<0.000000e+00> : vector<32xf32>
    %134 = vector.multi_reduction <add>, %131, %cst_63 [1] : vector<32x128xf32> to vector<32xf32>
    %135 = vector.shape_cast %134 : vector<32xf32> to vector<32x1xf32>
    %136 = arith.mulf %131, %131 : vector<32x128xf32>
    %cst_64 = arith.constant dense<0.000000e+00> : vector<32xf32>
    %137 = vector.multi_reduction <add>, %136, %cst_64 [1] : vector<32x128xf32> to vector<32xf32>
    %138 = vector.shape_cast %137 : vector<32xf32> to vector<32x1xf32>
    %cst_65 = arith.constant 1.280000e+02 : f32
    %139 = vector.broadcast %cst_65 : f32 to vector<32x1xf32>
    %140 = arith.divf %135, %139 : vector<32x1xf32>
    %cst_66 = arith.constant 1.280000e+02 : f32
    %141 = vector.broadcast %cst_66 : f32 to vector<32x1xf32>
    %142 = arith.divf %138, %141 : vector<32x1xf32>
    %143 = arith.mulf %140, %140 : vector<32x1xf32>
    %144 = arith.subf %142, %143 : vector<32x1xf32>
    %cst_67 = arith.constant 0.000000e+00 : f32
    %145 = vector.broadcast %cst_67 : f32 to vector<32x1xf32>
    %146 = arith.maximumf %144, %145 : vector<32x1xf32>
    %cst_68 = arith.constant 9.99999974E-6 : f32
    %147 = vector.broadcast %cst_68 : f32 to vector<32x1xf32>
    %148 = arith.addf %146, %147 : vector<32x1xf32>
    %149 = math.rsqrt %148 : vector<32x1xf32>
    %150 = arith.mulf %132, %149 : vector<32x1xf32>
    %151 = arith.mulf %140, %150 : vector<32x1xf32>
    %152 = arith.subf %133, %151 : vector<32x1xf32>
    %153 = vector.broadcast %150 : vector<32x1xf32> to vector<32x128xf32>
    %154 = arith.mulf %131, %153 : vector<32x128xf32>
    %155 = vector.broadcast %152 : vector<32x1xf32> to vector<32x128xf32>
    %156 = arith.addf %154, %155 : vector<32x128xf32>
    %157 = arith.addf %127, %156 : vector<32x128xf32>
    %cst_69 = arith.constant 0.000000e+00 : f32
    %158 = vector.broadcast %cst_69 : f32 to vector<32x128xf32>
    %159 = arith.maximumf %157, %158 : vector<32x128xf32>
    %c0_70 = arith.constant 0 : index
    %c0_71 = arith.constant 0 : index
    %160 = vector.load %arg16[%c0_70, %c0_71] : memref<32x128xf32, #tpu.memory_space<vmem>>, vector<32x128xf32>
    tpu.vector_store %arg16[%c0_70, %c0_71], %159 {strides = array<i32>} : memref<32x128xf32, #tpu.memory_space<vmem>>, vector<32x128xf32>,
    return
  }
}

</mosaic_0001>

<bundles_post_ra>
// kernel: tpu_custom_call.1
= control target key start
LH: loop header
LB: loop body
LE: loop exit
PB: predicated region body
PF: predicated region fallthrough
CT: control target
= control target key end

     0   :  { %s2392_s0 = inlined_call_operand.hbm [shape: f32[16,512], index: 0, kind: input, shape index: {}]   ;;  %s2393_s1 = inlined_call_operand.hbm [shape: f32[9,512], index: 1, kind: input, shape index: {}]   ;;  %s2394_s2 = inlined_call_operand.vmem [shape: bf16[8,16], index: 2, kind: input, shape index: {}]   ;;  %s2395_s3 = inlined_call_operand.vmem [shape: f32[8,1], index: 3, kind: input, shape index: {}]   ;;  %s2396_s4 = inlined_call_operand.vmem [shape: f32[8,1], index: 4, kind: input, shape index: {}]   ;;  %s2397_s5 = inlined_call_operand.vmem [shape: bf16[8,72], index: 5, kind: input, shape index: {}]   ;;  %s2398_s6 = inlined_call_operand.vmem [shape: f32[8,1], index: 6, kind: input, shape index: {}]   ;;  %s2399_s7 = inlined_call_operand.vmem [shape: f32[8,1], index: 7, kind: input, shape index: {}]   ;;  %s2400_s8 = inlined_call_operand.vmem [shape: bf16[32,8], index: 8, kind: input, shape index: {}]   ;;  %s2401_s9 = inlined_call_operand.vmem [shape: f32[32,1], index: 9, kind: input, shape index: {}]   ;;  %s2402_s10 = inlined_call_operand.vmem [shape: f32[32,1], index: 10, kind: input, shape index: {}]   ;;  %s2403_s11 = inlined_call_operand.vmem [shape: bf16[32,16], index: 11, kind: input, shape index: {}]   ;;  %s2404_s12 = inlined_call_operand.vmem [shape: f32[32,1], index: 12, kind: input, shape index: {}]   ;;  %s2405_s13 = inlined_call_operand.vmem [shape: f32[32,1], index: 13, kind: input, shape index: {}]   ;;  %s2406_s14 = inlined_call_operand.vmem [shape: bf16[512,128], index: 14, kind: input, shape index: {}]   ;;  %s2407_s15 = inlined_call_operand.hbm [shape: f32[16,128], index: 15, kind: input, shape index: {}]   ;;  %s2408_s16 = inlined_call_operand.hbm [shape: f32[32,128], index: 16, kind: output, shape index: {}]  }
   0x1   :  { %2410 = sst [smem:[#allocation12_spill]] %s2392_s0 }
   0x2   :  { %21 = vsyncpa [#allocation3], 0 }
   0x3   :  { %22 = vsyncpa [#allocation6], 0 }
   0x4   :  { %23 = vsyncpa [#allocation4], 0  ;;  %s1769_s21 = smov [#allocation5]   ;;  %s1770_s23 = smov [#allocation2]  }
   0x5   :  { %s41_s22 = sshll.u32 %s1769_s21, 4  ;;  %s29_s24 = sshll.u32 %s1770_s23, 4  ;;  %s42_s22 = int_to_ptr.vmem [resolvable:$true] %s41_s22  ;;  %s1871_s24 = int_to_ptr.vmem [resolvable:$true] %s29_s24 }
   0x6   :  { %s1675_s27 = scalar_lea.hbm %s2393_s1, 1024 }
   0x7   :  { %p1676_p0 = scmp.ne.s32.totalorder %s2393_s1, %s1675_s27  ;;  %p1679_p1 = scmp.lt.u32.totalorder %s1675_s27, %s2393_s1 }
   0x9   :  { %p1681_p2 = pnand %p1679_p1, %p1676_p0 }
   0xb   :  { %1684 = shalt.err (!%p1681_p2)
}
   0xc   :  { %s1685_s17 = scalar_lea.vmem %s42_s22, 1024  ;;  %p1690_p4 = scmp.lt.s32.totalorder %s42_s22, %s42_s22 }
   0xd   :  { %p1686_p3 = scmp.ne.s32.totalorder %s42_s22, %s1685_s17  ;;  %p1691_p5 = scmp.lt.s32.totalorder %s1685_s17, %s1685_s17 }
   0xf   :  { %p1692_p6 = por %p1691_p5, %p1690_p4 }
  0x11   :  { %p1693_p7 = pnand %p1692_p6, %p1686_p3 }
  0x13   :  { %1696 = shalt.err (!%p1693_p7)
}
  0x14   :  { %s1771_s18 = smov 512   ;;  %s1772_s19 = smov 32  }
  0x15   :  { %47 = dma.hbm_to_vmem [thread:$0]  %s2393_s1, 1024, %s42_s22, [#allocation6], %s1771_s18, %s1771_s18, %s1772_s19  }
  0x16   :  { %s2411_s26 = sld [smem:[#allocation12_spill]] }
  0x1c   :  { %s1697_s28 = scalar_lea.hbm %s2411_s26, 1024 }
  0x1d   :  { %p1698_p8 = scmp.ne.s32.totalorder %s2411_s26, %s1697_s28  ;;  %p1701_p9 = scmp.lt.u32.totalorder %s1697_s28, %s2411_s26 }
  0x1f   :  { %p1703_p10 = pnand %p1701_p9, %p1698_p8 }
  0x21   :  { %1706 = shalt.err (!%p1703_p10)
}
  0x22   :  { %s1707_s17 = scalar_lea.vmem %s1871_s24, 1024  ;;  %p1712_p12 = scmp.lt.s32.totalorder %s1871_s24, %s1871_s24 }
  0x23   :  { %p1708_p11 = scmp.ne.s32.totalorder %s1871_s24, %s1707_s17  ;;  %p1713_p13 = scmp.lt.s32.totalorder %s1707_s17, %s1707_s17 }
  0x25   :  { %p1714_p0 = por %p1713_p13, %p1712_p12 }
  0x27   :  { %p1715_p1 = pnand %p1714_p0, %p1708_p11 }
  0x29   :  { %1718 = shalt.err (!%p1715_p1)
}
  0x2a   :  { %35 = dma.hbm_to_vmem [thread:$0]  %s2411_s26, 1024, %s1871_s24, [#allocation3], %s1771_s18, %s1771_s18, %s1772_s19  }
  0x2b   :  { %s1773_s20 = smov [#allocation7]   ;;  %s1719_s28 = scalar_lea.hbm %s2407_s15, 256 }
  0x2c   :  { %s79_s21 = sshll.u32 %s1773_s20, 4  ;;  %p1720_p2 = scmp.ne.s32.totalorder %s2407_s15, %s1719_s28  ;;  %s80_s21 = int_to_ptr.vmem [resolvable:$true] %s79_s21 }
  0x2d   :  { %p1723_p3 = scmp.lt.u32.totalorder %s1719_s28, %s2407_s15 }
  0x2f   :  { %p1725_p4 = pnand %p1723_p3, %p1720_p2 }
  0x31   :  { %1728 = shalt.err (!%p1725_p4)
}
  0x32   :  { %s1729_s17 = scalar_lea.vmem %s80_s21, 256  ;;  %p1734_p6 = scmp.lt.s32.totalorder %s80_s21, %s80_s21 }
  0x33   :  { %p1730_p5 = scmp.ne.s32.totalorder %s80_s21, %s1729_s17  ;;  %p1735_p7 = scmp.lt.s32.totalorder %s1729_s17, %s1729_s17 }
  0x35   :  { %p1736_p8 = por %p1735_p7, %p1734_p6 }
  0x37   :  { %p1737_p9 = pnand %p1736_p8, %p1730_p5 }
  0x39   :  { %1740 = shalt.err (!%p1737_p9)
}
  0x3a   :  { %s1774_s24 = smov 128   ;;  %s1775_s18 = smov 8  }
  0x3b   :  { %85 = dma.hbm_to_vmem [thread:$0]  %s2407_s15, 256, %s80_s21, [#allocation6], %s1774_s24, %s1774_s24, %s1775_s18  }
  0x3c   :  { %1763 = dma.done.wait [#allocation3], 1024  }
  0x3d   :  { %1764 = vsyncadd [#allocation3], 4294966272 }
  0x3e   :  { %1765 = dma.done.wait [#allocation6], 1280  }
  0x3f   :  { %1766 = vsyncadd [#allocation6], 4294966016  ;;  %v1776_v0 = vmov 0   ;;  %v97_v1 = vld [vmem:[#allocation2 + $0x8] sm:$0xff]  ;;  %v99_v3 = vld [vmem:[#allocation2 + $0x18] sm:$0xff]  ;;  %vm109_vm0 = vcmask 130048   ;;  %v252_v62 = vlaneseq }
  0x40   :  { %145 = vmatprep.mubr.bf16.mxu0 %v1776_v0  ;;  %186 = vmatprep.mubr.bf16.mxu1 %v1776_v0  ;;  %v101_v2 = vld [vmem:[#allocation2 + $0x28] sm:$0xff]  ;;  %v103_v5 = vld [vmem:[#allocation2 + $0x38] sm:$0xff]  ;;  %v96_v6 = vld [vmem:[#allocation2] sm:$0xff]  ;;  %s1779_s23 = smov 15   ;;  %s1780_s25 = smov 1   ;;  %vm617_vm9 = vcmask 1043456  }
  0x41   :  { %1617 = vset.pattern.permute.xlu1 %v1776_v0  ;;  %1618 = vset.pattern.permute.xlu0 %v1776_v0  ;;  %v106_v4 = vpack.c.bf16 %v101_v2, %v97_v1  ;;  %v100_v7 = vld [vmem:[#allocation2 + $0x20] sm:$0xff]  ;;  %v108_v8 = vpack.c.bf16 %v103_v5, %v99_v3  ;;  %v98_v10 = vld [vmem:[#allocation2 + $0x10] sm:$0xff]  ;;  %s1781_s28 = smov 127   ;;  %s1782_s27 = smov 113   ;;  %v262_v1 = vshrl.u32 %v252_v62, 7  ;;  %v1968_v2 = vand.u32 127, %v252_v62 }
  0x42   :  { %v105_v9 = vpack.c.bf16 %v100_v7, %v96_v6  ;;  %v102_v11 = vld [vmem:[#allocation2 + $0x30] sm:$0xff]  ;;  %v104_v12 = vld [vmem:[%s2394_s2] sm:$0xf]  ;;  %s1783_s29 = smov 112   ;;  %s1784_s30 = smov 111   ;;  %vm613_vm10 = vcmask 588800  }
  0x43   :  { %113 = vmatprep.subr.bf16.mxu0 %v106_v4  ;;  %v107_v13 = vpack.c.bf16 %v102_v11, %v98_v10  ;;  %154 = vmatprep.subr.bf16.mxu1 %v108_v8  ;;  %v195_v40 = vld [vmem:[%s2395_s3] sm:$0xff]  ;;  %s1777_s3 = smov 17   ;;  %v1972_v7 = vsub.s32 0, %v262_v1  ;;  %vm293_vm1 = vcmp.lt.s32.totalorder %v1968_v2, 16  ;;  %vm254_vm2 = vcmp.lt.s32.totalorder %v1968_v2, 17 }
  0x44   :  { %114 = vmatpush1.bf16.msra.mxu0 %v105_v9  ;;  %v196_v43 = vld [vmem:[%s2396_s4] sm:$0xff]  ;;  %s1778_s4 = smov 16   ;;  %v1976_v8 = vsub.s32 1, %v262_v1  ;;  %vm333_vm3 = vcmp.lt.s32.totalorder %v1968_v2, 15  ;;  %vm373_vm4 = vcmp.lt.s32.totalorder %v1968_v2, 1  ;;  %vm440_vm5 = vcmp.lt.s32.totalorder %v1968_v2, 127 }
  0x45   :  { %155 = vmatpush1.bf16.msra.mxu1 %v107_v13  ;;  %v299_v5 = vld [vmem:[#allocation5 + $0x1] ss:$8 sm:$0xf]  ;;  %v259_v6 = vld [vmem:[#allocation5] ss:$8 sm:$0xf] }
  0x46   :  { %v304_v11 = vrot.slane %v299_v5, %v1972_v7  ;;  %vm480_vm6 = vcmp.lt.s32.totalorder %v1968_v2, 113  ;;  %vm520_vm7 = vcmp.lt.s32.totalorder %v1968_v2, 112  ;;  %vm560_vm8 = vcmp.lt.s32.totalorder %v1968_v2, 111 }
  0x47   :  { %1491 = vmatmul.mubr.msk.bf16.vlgmr.msra.gmra.mrb[0].mxu0 %vm109_vm0, %v104_v12  ;;  %vm1098_vm11 = vcmask 64512  }
  0x48   :  { %1492 = vmatmul.mubr.msk.bf16.vlgmr.msra.gmra.mrb[0].mxu1 %vm109_vm0, %v104_v12  ;;  %662 = vmatprep.mubr.bf16.mxu0 %v1776_v0  ;;  %v268_v12 = vrot.slane %v259_v6, %v1976_v8 }
  0x49   :  { %703 = vmatprep.mubr.bf16.mxu1 %v1776_v0 }
 0x11a   :  { %v147_v14 = vpop.f32.mrb[0].mxu0 }
 0x11b   :  { %v202_v15 = vmul.f32 %v147_v14, %v147_v14  ;;  %v188_v16 = vpop.f32.mrb[0].mxu1  ;;  %v149_v17 = vpop.f32.mrb[1].mxu0 }
 0x11c   :  { %v204_v18 = vmul.f32 %v188_v16, %v188_v16  ;;  %v197_v19 = vadd.f32 %v149_v17, %v147_v14  ;;  %v203_v20 = vmul.f32 %v149_v17, %v149_v17  ;;  %v190_v21 = vpop.f32.mrb[1].mxu1  ;;  %v151_v22 = vpop.f32.mrb[2].mxu0 }
 0x11d   :  { %v192_v23 = vpop.f32.mrb[2].mxu1  ;;  %v152_v24 = vpop.f32.mrb[3].mxu0  ;;  %v205_v29 = vmul.f32 %v190_v21, %v190_v21 }
 0x11e   :  { %v193_v25 = vpop.f32.mrb[3].mxu1  ;;  %v198_v26 = vadd.f32 %v197_v19, %v188_v16  ;;  %v206_v27 = vadd.f32 %v203_v20, %v202_v15 }
 0x120   :  { %v199_v28 = vadd.f32 %v198_v26, %v190_v21  ;;  %v207_v30 = vadd.f32 %v206_v27, %v204_v18  ;;  %v1990_v18 = vsub.s32 3, %v262_v1 }
 0x122   :  { %200 = vadd.xlane.f32.xlu0 %v199_v28  ;;  %v208_v31 = vadd.f32 %v207_v30, %v205_v29  ;;  %v276_v23 = vrot.slane %v259_v6, %v1990_v18  ;;  %v316_v29 = vrot.slane %v299_v5, %v1990_v18 }
 0x126   :  { %209 = vadd.xlane.f32.xlu0 %v208_v31 }
 0x1af   :  { %v201_v32 = vpop.xlane.xlu0 %200 }
 0x1b0   :  { %v212_v33 = vmul.f32 0.001953125, %v201_v32 }
 0x1b2   :  { %v214_v35 = vmul.f32 %v212_v33, %v212_v33 }
 0x1b3   :  { %v210_v34 = vpop.xlane.xlu0 %209 }
 0x1b4   :  { %v213_v36 = vmul.f32 0.001953125, %v210_v34 }
 0x1b6   :  { %v215_v37 = vsub.f32 %v213_v36, %v214_v35 }
 0x1b8   :  { %v216_v38 = vmax.f32 %v215_v37, 0.0 }
 0x1ba   :  { %v217_v39 = vadd.f32 1e-05, %v216_v38 }
 0x1bc   :  { %1655 = vrsqrt.f32 %v217_v39 }
 0x1c6   :  { %v1656_v41 = vpop.eup %1655 }
 0x1c7   :  { %v219_v42 = vmul.f32 %v1656_v41, %v195_v40 }
 0x1c9   :  { %224 = vperm.xlu1 %1617, %v219_v42   ;;  %v220_v44 = vmul.f32 %v219_v42, %v212_v33 }
 0x1cb   :  { %v221_v45 = vsub.f32 %v196_v43, %v220_v44 }
 0x1cd   :  { %233 = vperm.xlu1 %1617, %v221_v45  }
 0x248   :  { %v225_v46 = vpop.permute.xlu1 %224 }
 0x249   :  { %v227_v47 = vmul.f32 %v225_v46, %v147_v14  ;;  %v228_v48 = vmul.f32 %v225_v46, %v149_v17  ;;  %v229_v50 = vmul.f32 %v225_v46, %v188_v16  ;;  %v230_v51 = vmul.f32 %v225_v46, %v190_v21 }
 0x24a   :  { %v308_v14 = vrot.slane %v299_v5, %v1976_v8  ;;  %v1987_v16 = vsub.s32 2, %v262_v1  ;;  %v264_v17 = vrot.slane %v259_v6, %v1972_v7 }
 0x24c   :  { %v234_v49 = vpop.permute.xlu1 %233  ;;  %v272_v22 = vrot.slane %v259_v6, %v1987_v16  ;;  %v312_v28 = vrot.slane %v299_v5, %v1987_v16  ;;  %v406_v6 = vld [vmem:[#allocation5 + $0x4] ss:$8 sm:$0xf] }
 0x24d   :  { %v236_v52 = vadd.f32 %v234_v49, %v227_v47  ;;  %v237_v53 = vadd.f32 %v234_v49, %v228_v48  ;;  %v238_v54 = vadd.f32 %v234_v49, %v229_v50  ;;  %v239_v55 = vadd.f32 %v234_v49, %v230_v51  ;;  %v339_v47 = vld [vmem:[#allocation5 + $0x2] ss:$8 sm:$0xf]  ;;  %v379_v48 = vld [vmem:[#allocation5 + $0x3] ss:$8 sm:$0xf] }
 0x24e   :  { %v344_v51 = vrot.slane %v339_v47, %v1972_v7  ;;  %v356_v62 = vrot.slane %v339_v47, %v1990_v18  ;;  %v396_v5 = vrot.slane %v379_v48, %v1990_v18 }
 0x24f   :  { %v1928_v56 = vmax.f32 %v236_v52, 0.0  ;;  %v1930_v57 = vmax.f32 %v237_v53, 0.0  ;;  %v1934_v58 = vmax.f32 %v238_v54, 0.0  ;;  %v1936_v59 = vmax.f32 %v239_v55, 0.0 }
 0x250   :  { %v348_v52 = vrot.slane %v339_v47, %v1976_v8  ;;  %v384_v53 = vrot.slane %v379_v48, %v1972_v7  ;;  %v388_v54 = vrot.slane %v379_v48, %v1976_v8 }
 0x251   :  { %246 = vrot.lane.b32.xlu1 %v1930_v57, %s1777_s3  ;;  %244 = vrot.lane.b32.xlu0 %v1928_v56, %s1777_s3 }
 0x255   :  { %248 = vrot.lane.b32.xlu1 %v1934_v58, %s1777_s3  ;;  %291 = vrot.lane.b32.xlu0 %v1936_v59, %s1778_s4 }
 0x259   :  { %250 = vrot.lane.b32.xlu1 %v1936_v59, %s1777_s3  ;;  %327 = vrot.lane.b32.xlu0 %v1930_v57, %s1779_s23 }
 0x25d   :  { %285 = vrot.lane.b32.xlu1 %v1928_v56, %s1778_s4  ;;  %331 = vrot.lane.b32.xlu0 %v1936_v59, %s1779_s23 }
 0x261   :  { %287 = vrot.lane.b32.xlu1 %v1930_v57, %s1778_s4  ;;  %367 = vrot.lane.b32.xlu0 %v1930_v57, %s1780_s25 }
 0x265   :  { %289 = vrot.lane.b32.xlu1 %v1934_v58, %s1778_s4  ;;  %371 = vrot.lane.b32.xlu0 %v1936_v59, %s1780_s25 }
 0x269   :  { %325 = vrot.lane.b32.xlu1 %v1928_v56, %s1779_s23  ;;  %434 = vrot.lane.b32.xlu0 %v1930_v57, %s1781_s28 }
 0x26d   :  { %329 = vrot.lane.b32.xlu1 %v1934_v58, %s1779_s23  ;;  %438 = vrot.lane.b32.xlu0 %v1936_v59, %s1781_s28 }
 0x271   :  { %365 = vrot.lane.b32.xlu1 %v1928_v56, %s1780_s25  ;;  %474 = vrot.lane.b32.xlu0 %v1930_v57, %s1782_s27 }
 0x275   :  { %369 = vrot.lane.b32.xlu1 %v1934_v58, %s1780_s25  ;;  %478 = vrot.lane.b32.xlu0 %v1936_v59, %s1782_s27 }
 0x279   :  { %432 = vrot.lane.b32.xlu1 %v1928_v56, %s1781_s28  ;;  %514 = vrot.lane.b32.xlu0 %v1930_v57, %s1783_s29 }
 0x27d   :  { %436 = vrot.lane.b32.xlu1 %v1934_v58, %s1781_s28  ;;  %518 = vrot.lane.b32.xlu0 %v1936_v59, %s1783_s29 }
 0x281   :  { %472 = vrot.lane.b32.xlu1 %v1928_v56, %s1782_s27  ;;  %554 = vrot.lane.b32.xlu0 %v1930_v57, %s1784_s30 }
 0x285   :  { %476 = vrot.lane.b32.xlu1 %v1934_v58, %s1782_s27  ;;  %558 = vrot.lane.b32.xlu0 %v1936_v59, %s1784_s30 }
 0x289   :  { %512 = vrot.lane.b32.xlu1 %v1928_v56, %s1783_s29 }
 0x28d   :  { %516 = vrot.lane.b32.xlu1 %v1934_v58, %s1783_s29 }
 0x291   :  { %552 = vrot.lane.b32.xlu1 %v1928_v56, %s1784_s30 }
 0x295   :  { %556 = vrot.lane.b32.xlu1 %v1934_v58, %s1784_s30 }
 0x2c3   :  { %v247_v60 = vpop.permute.xlu1 %246  ;;  %v245_v61 = vpop.permute.xlu0 %244 }
 0x2c4   :  { %v257_v15 = vsel %vm254_vm2, %v245_v61, %v247_v60 }
 0x2c5   :  { %v282_v26 = vmul.f32 %v268_v12, %v257_v15  ;;  %v446_v15 = vld [vmem:[#allocation5 + $0x5] ss:$8 sm:$0xf] }
 0x2c7   :  { %v249_v63 = vpop.permute.xlu1 %248  ;;  %v292_v0 = vpop.permute.xlu0 %291 }
 0x2c8   :  { %v256_v30 = vsel %vm254_vm2, %v247_v60, %v249_v63 }
 0x2c9   :  { %v283_v39 = vmul.f32 %v272_v22, %v256_v30 }
 0x2cb   :  { %v251_v3 = vpop.permute.xlu1 %250  ;;  %v1970_v4 = vpop.permute.xlu0 %327 }
 0x2cc   :  { %v258_v19 = vsel %vm254_vm2, %v251_v3, %v245_v61  ;;  %v255_v31 = vsel %vm254_vm2, %v249_v63, %v251_v3  ;;  %v352_v61 = vrot.slane %v339_v47, %v1987_v16  ;;  %v392_v3 = vrot.slane %v379_v48, %v1987_v16 }
 0x2cd   :  { %v281_v32 = vmul.f32 %v264_v17, %v258_v19  ;;  %v284_v40 = vmul.f32 %v276_v23, %v255_v31 }
 0x2cf   :  { %v286_v9 = vpop.permute.xlu1 %285  ;;  %v1978_v10 = vpop.permute.xlu0 %331 }
 0x2d0   :  { %v297_v13 = vsel %vm293_vm1, %v292_v0, %v286_v9 }
 0x2d1   :  { %v321_v24 = vmul.f32 %v304_v11, %v297_v13 }
 0x2d3   :  { %v288_v20 = vpop.permute.xlu1 %287  ;;  %v1994_v21 = vpop.permute.xlu0 %367  ;;  %v592_v36 = vpack.c.bf16 %v321_v24, %v281_v32  ;;  %v423_v24 = vrot.slane %v406_v6, %v1990_v18 }
 0x2d4   :  { %v296_v25 = vsel %vm293_vm1, %v286_v9, %v288_v20 }
 0x2d5   :  { %v322_v27 = vmul.f32 %v308_v14, %v296_v25 }
 0x2d7   :  { %v290_v33 = vpop.permute.xlu1 %289  ;;  %v372_v34 = vpop.permute.xlu0 %371  ;;  %v593_v35 = vpack.c.bf16 %v322_v27, %v282_v26 }
 0x2d8   :  { %v294_v37 = vsel %vm293_vm1, %v290_v33, %v292_v0  ;;  %v295_v38 = vsel %vm293_vm1, %v288_v20, %v290_v33 }
 0x2d9   :  { %v323_v41 = vmul.f32 %v312_v28, %v295_v38  ;;  %v324_v42 = vmul.f32 %v316_v29, %v294_v37  ;;  %630 = vmatprep.subr.bf16.mxu0 %v593_v35  ;;  %v451_v35 = vrot.slane %v446_v15, %v1972_v7  ;;  %v415_v37 = vrot.slane %v406_v6, %v1976_v8 }
 0x2da   :  { %631 = vmatpush1.bf16.msra.mxu0 %v592_v36  ;;  %v431_v36 = vmul.f32 %v423_v24, %v1936_v59 }
 0x2db   :  { %v594_v43 = vpack.c.bf16 %v323_v41, %v283_v39  ;;  %v326_v44 = vpop.permute.xlu1 %325  ;;  %v2010_v45 = vpop.permute.xlu0 %434  ;;  %v595_v46 = vpack.c.bf16 %v324_v42, %v284_v40  ;;  %v455_v40 = vrot.slane %v446_v15, %v1976_v8  ;;  %v459_v41 = vrot.slane %v446_v15, %v1987_v16 }
 0x2dc   :  { %v336_v55 = vsel %vm333_vm3, %v326_v44, %v1970_v4  ;;  %v337_v60 = vsel %vm333_vm3, %v1978_v10, %v326_v44  ;;  %v411_v42 = vrot.slane %v406_v6, %v1972_v7 }
 0x2dd   :  { %671 = vmatprep.subr.bf16.mxu1 %v595_v46  ;;  %v361_v9 = vmul.f32 %v344_v51, %v337_v60  ;;  %v362_v11 = vmul.f32 %v348_v52, %v336_v55 }
 0x2de   :  { %672 = vmatpush1.bf16.msra.mxu1 %v594_v43 }
 0x2df   :  { %v330_v49 = vpop.permute.xlu1 %329  ;;  %v439_v50 = vpop.permute.xlu0 %438 }
 0x2e0   :  { %v334_v17 = vsel %vm333_vm3, %v330_v49, %v1978_v10  ;;  %v335_v19 = vsel %vm333_vm3, %v1970_v4, %v330_v49  ;;  %v463_v10 = vrot.slane %v446_v15, %v1990_v18 }
 0x2e1   :  { %v363_v27 = vmul.f32 %v352_v61, %v335_v19  ;;  %v364_v28 = vmul.f32 %v356_v62, %v334_v17 }
 0x2e3   :  { %v366_v63 = vpop.permute.xlu1 %365  ;;  %v2033_v14 = vpop.permute.xlu0 %474 }
 0x2e4   :  { %v376_v0 = vsel %vm373_vm4, %v366_v63, %v1994_v21  ;;  %v377_v1 = vsel %vm373_vm4, %v372_v34, %v366_v63  ;;  %v526_v63 = vld [vmem:[#allocation5 + $0x7] ss:$8 sm:$0xf] }
 0x2e5   :  { %v401_v12 = vmul.f32 %v384_v53, %v377_v1  ;;  %v402_v13 = vmul.f32 %v388_v54, %v376_v0  ;;  %v429_v53 = vmul.f32 %v415_v37, %v1930_v57  ;;  %v428_v54 = vmul.f32 %v411_v42, %v1928_v56 }
 0x2e6   :  { %v543_v57 = vrot.slane %v526_v63, %v1990_v18 }
 0x2e7   :  { %v596_v20 = vpack.c.bf16 %v401_v12, %v361_v9  ;;  %v370_v22 = vpop.permute.xlu1 %369  ;;  %v597_v23 = vpack.c.bf16 %v402_v13, %v362_v11  ;;  %v479_v31 = vpop.permute.xlu0 %478  ;;  %v535_v11 = vrot.slane %v526_v63, %v1976_v8  ;;  %v566_v12 = vld [vmem:[#allocation5 + $0x20] ss:$8 sm:$0xf] }
 0x2e8   :  { %v374_v25 = vsel %vm373_vm4, %v370_v22, %v372_v34  ;;  %v375_v26 = vsel %vm373_vm4, %v1994_v21, %v370_v22  ;;  %v419_v34 = vrot.slane %v406_v6, %v1987_v16  ;;  %v531_v6 = vrot.slane %v526_v63, %v1972_v7 }
 0x2e9   :  { %v403_v29 = vmul.f32 %v392_v3, %v375_v26  ;;  %v404_v4 = vmul.f32 %v396_v5, %v374_v25  ;;  %632 = vmatprep.subr.bf16.mxu0 %v597_v23  ;;  %v579_v42 = vrot.slane %v566_v12, %v1987_v16 }
 0x2ea   :  { %633 = vmatpush1.bf16.msra.mxu0 %v596_v20  ;;  %v430_v49 = vmul.f32 %v419_v34, %v1934_v58  ;;  %v539_v20 = vrot.slane %v526_v63, %v1987_v16  ;;  %v1626_v63 = vld [vmem:[%s2406_s14 + $0x88] sm:$0xff]  }
 0x2eb   :  { %v598_v30 = vpack.c.bf16 %v403_v29, %v363_v27  ;;  %v433_v32 = vpop.permute.xlu1 %432  ;;  %v599_v33 = vpack.c.bf16 %v404_v4, %v364_v28  ;;  %v515_v48 = vpop.permute.xlu0 %514  ;;  %v571_v27 = vrot.slane %v566_v12, %v1972_v7 }
 0x2ec   :  { %v444_v21 = vsel %vm440_vm5, %v439_v50, %v433_v32  ;;  %v443_v38 = vsel %vm440_vm5, %v433_v32, %v2010_v45 }
 0x2ed   :  { %v471_v39 = vmul.f32 %v463_v10, %v444_v21  ;;  %673 = vmatprep.subr.bf16.mxu1 %v599_v33  ;;  %v468_v46 = vmul.f32 %v451_v35, %v443_v38 }
 0x2ee   :  { %674 = vmatpush1.bf16.msra.mxu1 %v598_v30  ;;  %v583_v30 = vrot.slane %v566_v12, %v1990_v18 }
 0x2ef   :  { %v437_v43 = vpop.permute.xlu1 %436  ;;  %v603_v44 = vpack.c.bf16 %v471_v39, %v431_v36  ;;  %v600_v62 = vpack.c.bf16 %v468_v46, %v428_v54  ;;  %v612_v54 = vld [vmem:[%s2397_s5] sm:$0xf] }
 0x2f0   :  { %v441_v59 = vsel %vm440_vm5, %v437_v43, %v439_v50  ;;  %v442_v47 = vsel %vm440_vm5, %v2010_v45, %v437_v43  ;;  %v486_v50 = vld [vmem:[#allocation5 + $0x6] ss:$8 sm:$0xf]  ;;  %v519_v45 = vpop.permute.xlu0 %518 }
 0x2f1   :  { %v469_v51 = vmul.f32 %v455_v40, %v442_v47  ;;  %v470_v52 = vmul.f32 %v459_v41, %v441_v59  ;;  %675 = vmatprep.subr.bf16.mxu1 %v603_v44  ;;  %v503_v0 = vrot.slane %v486_v50, %v1990_v18  ;;  %v495_v1 = vrot.slane %v486_v50, %v1976_v8 }
 0x2f2   :  { %v499_v5 = vrot.slane %v486_v50, %v1987_v16  ;;  %v491_v22 = vrot.slane %v486_v50, %v1972_v7  ;;  %v575_v40 = vrot.slane %v566_v12, %v1976_v8  ;;  %v1619_v16 = vld [vmem:[%s2406_s14 + $0x40] sm:$0xff]   ;;  %v1625_v50 = vld [vmem:[%s2406_s14 + $0x8] sm:$0xff]  }
 0x2f3   :  { %v602_v55 = vpack.c.bf16 %v470_v52, %v430_v49  ;;  %v473_v60 = vpop.permute.xlu1 %472  ;;  %v601_v61 = vpack.c.bf16 %v469_v51, %v429_v53  ;;  %v1620_v52 = vld [vmem:[%s2406_s14 + $0xc0] sm:$0xff]  }
 0x2f4   :  { %v484_v56 = vsel %vm480_vm6, %v479_v31, %v473_v60  ;;  %v555_v15 = vpop.permute.xlu0 %554  ;;  %v483_v25 = vsel %vm480_vm6, %v473_v60, %v2033_v14  ;;  %v1622_v60 = vld [vmem:[%s2406_s14 + $0x80] sm:$0xff]  }
 0x2f5   :  { %634 = vmatprep.subr.bf16.mxu0 %v601_v61  ;;  %676 = vmatpush1.bf16.msra.mxu1 %v602_v55  ;;  %v511_v13 = vmul.f32 %v503_v0, %v484_v56  ;;  %v1621_v55 = vld [vmem:[%s2406_s14] sm:$0xff]   ;;  %v1623_v61 = vld [vmem:[%s2406_s14 + $0x48] sm:$0xff]   ;;  %v1629_v0 = vld [vmem:[%s2406_s14 + $0x10] sm:$0xff]  }
 0x2f6   :  { %635 = vmatpush1.bf16.msra.mxu0 %v600_v62  ;;  %v1624_v62 = vld [vmem:[%s2406_s14 + $0xc8] sm:$0xff]   ;;  %v1631_v56 = vld [vmem:[%s2406_s14 + $0x58] sm:$0xff]   ;;  %v1638_v12 = vld [vmem:[%s2406_s14 + $0xa0] sm:$0xff]  }
 0x2f7   :  { %v477_v58 = vpop.permute.xlu1 %476 }
 0x2f8   :  { %v481_v23 = vsel %vm480_vm6, %v477_v58, %v479_v31  ;;  %v482_v24 = vsel %vm480_vm6, %v2033_v14, %v477_v58  ;;  %v508_v14 = vmul.f32 %v491_v22, %v483_v25  ;;  %v559_v35 = vpop.permute.xlu0 %558  ;;  %v1628_v58 = vld [vmem:[%s2406_s14 + $0xd0] sm:$0xff]   ;;  %v1647_v25 = vld [vmem:[%s2406_s14 + $0x78] sm:$0xff]  }
 0x2f9   :  { %v509_v31 = vmul.f32 %v495_v1, %v482_v24  ;;  %v510_v32 = vmul.f32 %v499_v5, %v481_v23  ;;  %v1632_v1 = vld [vmem:[%s2406_s14 + $0xd8] sm:$0xff]   ;;  %v1644_v22 = vld [vmem:[%s2406_s14 + $0xf0] sm:$0xff]  }
 0x2fa   :  { %v1634_v5 = vld [vmem:[%s2406_s14 + $0x98] sm:$0xff]   ;;  %v1645_v23 = vld [vmem:[%s2406_s14 + $0x30] sm:$0xff]  }
 0x2fb   :  { %v513_v3 = vpop.permute.xlu1 %512  ;;  %v1646_v24 = vld [vmem:[%s2406_s14 + $0xb0] sm:$0xff]  }
 0x2fc   :  { %v524_v9 = vsel %vm520_vm7, %v519_v45, %v513_v3  ;;  %v523_v17 = vsel %vm520_vm7, %v513_v3, %v515_v48  ;;  %v1633_v3 = vld [vmem:[%s2406_s14 + $0x18] sm:$0xff]  }
 0x2fd   :  { %v551_v19 = vmul.f32 %v543_v57, %v524_v9  ;;  %v548_v28 = vmul.f32 %v531_v6, %v523_v17  ;;  %v1630_v57 = vld [vmem:[%s2406_s14 + $0x90] sm:$0xff]   ;;  %v1635_v6 = vld [vmem:[%s2406_s14 + $0x60] sm:$0xff]   ;;  %v1641_v17 = vld [vmem:[%s2406_s14 + $0x28] sm:$0xff]  }
 0x2fe   :  { %v1636_v9 = vld [vmem:[%s2406_s14 + $0xe0] sm:$0xff]  }
 0x2ff   :  { %v517_v26 = vpop.permute.xlu1 %516  ;;  %v607_v10 = vpack.c.bf16 %v551_v19, %v511_v13  ;;  %v604_v7 = vpack.c.bf16 %v548_v28, %v508_v14  ;;  %v1639_v13 = vld [vmem:[%s2406_s14 + $0x68] sm:$0xff]  }
 0x300   :  { %v521_v29 = vsel %vm520_vm7, %v517_v26, %v519_v45  ;;  %v522_v4 = vsel %vm520_vm7, %v515_v48, %v517_v26  ;;  %v1627_v45 = vld [vmem:[%s2406_s14 + $0x50] sm:$0xff]   ;;  %v1642_v19 = vld [vmem:[%s2406_s14 + $0xa8] sm:$0xff]   ;;  %v1648_v26 = vld [vmem:[%s2406_s14 + $0xf8] sm:$0xff]  }
 0x301   :  { %v549_v33 = vmul.f32 %v535_v11, %v522_v4  ;;  %v550_v34 = vmul.f32 %v539_v20, %v521_v29  ;;  %677 = vmatprep.subr.bf16.mxu1 %v607_v10  ;;  %v1637_v11 = vld [vmem:[%s2406_s14 + $0x20] sm:$0xff]   ;;  %v1643_v20 = vld [vmem:[%s2406_s14 + $0x70] sm:$0xff]   ;;  %v1649_v10 = vld [vmem:[%s2406_s14 + $0x38] sm:$0xff]  }
 0x303   :  { %v606_v21 = vpack.c.bf16 %v550_v34, %v510_v32  ;;  %v553_v36 = vpop.permute.xlu1 %552  ;;  %v605_v37 = vpack.c.bf16 %v549_v33, %v509_v31 }
 0x304   :  { %v563_v38 = vsel %vm560_vm8, %v553_v36, %v555_v15  ;;  %v564_v39 = vsel %vm560_vm8, %v559_v35, %v553_v36 }
 0x305   :  { %v588_v18 = vmul.f32 %v571_v27, %v563_v38  ;;  %v591_v41 = vmul.f32 %v583_v30, %v564_v39  ;;  %636 = vmatprep.subr.bf16.mxu0 %v605_v37  ;;  %678 = vmatpush1.bf16.msra.mxu1 %v606_v21  ;;  %v1650_v27 = vld [vmem:[%s2406_s14 + $0xb8] sm:$0xff]  }
 0x306   :  { %637 = vmatpush1.bf16.msra.mxu0 %v604_v7 }
 0x307   :  { %v611_v43 = vpack.c.bf16 %v591_v41, %v591_v41  ;;  %v557_v44 = vpop.permute.xlu1 %556  ;;  %v608_v47 = vpack.c.bf16 %v588_v18, %v588_v18 }
 0x308   :  { %v561_v46 = vsel %vm560_vm8, %v557_v44, %v559_v35  ;;  %v562_v59 = vsel %vm560_vm8, %v555_v15, %v557_v44  ;;  %v1640_v15 = vld [vmem:[%s2406_s14 + $0xe8] sm:$0xff]  }
 0x309   :  { %v589_v48 = vmul.f32 %v575_v40, %v562_v59  ;;  %v590_v49 = vmul.f32 %v579_v42, %v561_v46  ;;  %1495 = vmatprep.subr.msk.bf16.mxu1 %vm617_vm9, %v611_v43  ;;  %v619_v2 = vsel %vm617_vm9, %v608_v47, 0  ;;  %v1273_v47 = vld [vmem:[#allocation7] sm:$0xff] }
 0x30b   :  { %v609_v8 = vpack.c.bf16 %v589_v48, %v589_v48  ;;  %v610_v51 = vpack.c.bf16 %v590_v49, %v590_v49  ;;  %v1274_v48 = vld [vmem:[#allocation7 + $0x8] sm:$0xff] }
 0x30c   :  { %v1279_v49 = vpack.c.bf16 %v1274_v48, %v1273_v47  ;;  %v1346_v47 = vld [vmem:[%s2404_s12 + $0x8] sm:$0xff]  ;;  %v1345_v48 = vld [vmem:[%s2404_s12] sm:$0xff] }
 0x30d   :  { %1493 = vmatprep.subr.msk.bf16.mxu0 %vm617_vm9, %v609_v8  ;;  %v625_v53 = vsel %vm617_vm9, %v610_v51, 0  ;;  %v1651_v8 = vld [vmem:[%s2403_s11] sm:$0xff]   ;;  %v1652_v51 = vld [vmem:[%s2403_s11 + $0x8] sm:$0xff]  }
 0x30e   :  { %639 = vmatpush1.bf16.msra.mxu0 %v619_v2  ;;  %680 = vmatpush1.bf16.msra.mxu1 %v625_v53 }
 0x30f   :  { %1537 = vmatprep.subr.bf16.mxu0 %v1619_v16  ;;  %1559 = vmatprep.subr.bf16.mxu1 %v1620_v52 }
 0x311   :  { %1494 = vmatmul.mubr.msk.bf16.vlgmr.msra.gmra.mrb[4].mxu0 %vm613_vm10, %v612_v54  ;;  %1496 = vmatmul.mubr.msk.bf16.vlgmr.msra.gmra.mrb[4].mxu1 %vm613_vm10, %v612_v54 }
 0x312   :  { %1538 = vmatpush3.bf16.msra.mxu0 %v1621_v55  ;;  %1560 = vmatpush3.bf16.msra.mxu1 %v1622_v60 }
 0x313   :  { %1539 = vmatprep.subr.bf16.mxu0 %v1623_v61  ;;  %1561 = vmatprep.subr.bf16.mxu1 %v1624_v62  ;;  %v1052_v62 = vld [vmem:[%s2398_s6] sm:$0xff] }
 0x316   :  { %1540 = vmatpush3.bf16.msra.mxu0 %v1625_v50  ;;  %1562 = vmatpush3.bf16.msra.mxu1 %v1626_v63 }
 0x317   :  { %1541 = vmatprep.subr.bf16.mxu0 %v1627_v45  ;;  %1563 = vmatprep.subr.bf16.mxu1 %v1628_v58  ;;  %v1053_v45 = vld [vmem:[%s2399_s7] sm:$0xff] }
 0x31a   :  { %1542 = vmatpush3.bf16.msra.mxu0 %v1629_v0  ;;  %1564 = vmatpush3.bf16.msra.mxu1 %v1630_v57  ;;  %v1653_v57 = vld [vmem:[%s2400_s8] sm:$0xff]  }
 0x31b   :  { %1543 = vmatprep.subr.bf16.mxu0 %v1631_v56  ;;  %1565 = vmatprep.subr.bf16.mxu1 %v1632_v1 }
 0x31e   :  { %1544 = vmatpush3.bf16.msra.mxu0 %v1633_v3  ;;  %1566 = vmatpush3.bf16.msra.mxu1 %v1634_v5 }
 0x31f   :  { %1545 = vmatprep.subr.bf16.mxu0 %v1635_v6  ;;  %1567 = vmatprep.subr.bf16.mxu1 %v1636_v9 }
 0x322   :  { %1546 = vmatpush3.bf16.msra.mxu0 %v1637_v11  ;;  %1568 = vmatpush3.bf16.msra.mxu1 %v1638_v12 }
 0x323   :  { %1547 = vmatprep.subr.bf16.mxu0 %v1639_v13  ;;  %1569 = vmatprep.subr.bf16.mxu1 %v1640_v15 }
 0x326   :  { %1548 = vmatpush3.bf16.msra.mxu0 %v1641_v17  ;;  %1570 = vmatpush3.bf16.msra.mxu1 %v1642_v19 }
 0x327   :  { %1549 = vmatprep.subr.bf16.mxu0 %v1643_v20  ;;  %1571 = vmatprep.subr.bf16.mxu1 %v1644_v22  ;;  %v1654_v22 = vld [vmem:[%s2400_s8 + $0x8] sm:$0xff]  }
 0x32a   :  { %1550 = vmatpush3.bf16.msra.mxu0 %v1645_v23  ;;  %1572 = vmatpush3.bf16.msra.mxu1 %v1646_v24 }
 0x32b   :  { %1551 = vmatprep.subr.bf16.mxu0 %v1647_v25  ;;  %1573 = vmatprep.subr.bf16.mxu1 %v1648_v26 }
 0x32e   :  { %1552 = vmatpush3.bf16.msra.mxu0 %v1649_v10  ;;  %1574 = vmatpush3.bf16.msra.mxu1 %v1650_v27 }
 0x32f   :  { %1593 = vmatprep.subr.bf16.mxu1 %v1279_v49 }
 0x3e4   :  { %v664_v28 = vpop.f32.mrb[4].mxu0  ;;  %v705_v29 = vpop.f32.mrb[4].mxu1 }
 0x3e5   :  { %v666_v4 = vpop.f32.mrb[5].mxu0  ;;  %v707_v30 = vpop.f32.mrb[5].mxu1  ;;  %v712_v14 = vpack.c.bf16 %v664_v28, %v664_v28  ;;  %v714_v35 = vpack.c.bf16 %v705_v29, %v705_v29 }
 0x3e6   :  { %v713_v31 = vpack.c.bf16 %v666_v4, %v666_v4  ;;  %v715_v32 = vpack.c.bf16 %v707_v30, %v707_v30  ;;  %v668_v33 = vpop.f32.mrb[6].mxu0  ;;  %v709_v34 = vpop.f32.mrb[6].mxu1 }
 0x3e7   :  { %v669_v21 = vpop.f32.mrb[7].mxu0  ;;  %v710_v36 = vpop.f32.mrb[7].mxu1 }
 0x3e8   :  { %1004 = vmatprep.mubr.bf16.mxu0 %v713_v31  ;;  %1044 = vmatprep.mubr.bf16.mxu1 %v715_v32 }
 0x3e9   :  { %1005 = vmatmul.mubr.bf16.vlgmr.msra.gmra.mrb[8].mxu0 %v712_v14  ;;  %1045 = vmatmul.mubr.bf16.vlgmr.msra.gmra.mrb[8].mxu1 %v714_v35 }
 0x3ea   :  { %1594 = vmatpush3.bf16.msra.mxu1 %v1279_v49  ;;  %1595 = vmatprep.mubr.msk.bf16.mxu1 %vm109_vm0, %v1651_v8 }
 0x3eb   :  { %1589 = vmatprep.mubr.msk.bf16.mxu0 %vm1098_vm11, %v1653_v57 }
 0x3f1   :  { %1596 = vmatmul.mubr.msk.bf16.vlgmr.msra.gmra.mrb[12].mxu1 %vm109_vm0, %v1652_v51 }
 0x4bc   :  { %v1553_v37 = vpop.f32.mrb[8].mxu0  ;;  %v1575_v7 = vpop.f32.mrb[8].mxu1 }
 0x4bd   :  { %v1554_v38 = vpop.f32.mrb[9].mxu0  ;;  %v1576_v39 = vpop.f32.mrb[9].mxu1 }
 0x4be   :  { %v1555_v40 = vadd.f32 %v1554_v38, %v1553_v37  ;;  %v1577_v18 = vadd.f32 %v1576_v39, %v1575_v7  ;;  %v1556_v41 = vpop.f32.mrb[10].mxu0  ;;  %v1578_v42 = vpop.f32.mrb[10].mxu1 }
 0x4bf   :  { %v1557_v43 = vpop.f32.mrb[11].mxu0  ;;  %v1579_v44 = vpop.f32.mrb[11].mxu1 }
 0x4c0   :  { %v1047_v46 = vadd.f32 %v1577_v18, %v1555_v40 }
 0x4c2   :  { %1054 = vadd.xlane.f32.xlu1 %v1047_v46  ;;  %v1056_v59 = vmul.f32 %v1047_v46, %v1047_v46 }
 0x4c4   :  { %1057 = vadd.xlane.f32.xlu0 %v1056_v59  ;;  %v2231_v56 = vpop.f32.mrb[12].mxu1 }
 0x4c5   :  { %v2233_v1 = vpop.f32.mrb[13].mxu1  ;;  %v1363_v44 = vmul.f32 %v2231_v56, %v2231_v56 }
 0x4c6   :  { %v2236_v3 = vpop.f32.mrb[14].mxu1  ;;  %v1361_v9 = vmul.f32 %v2233_v1, %v2233_v1 }
 0x4c7   :  { %v2238_v5 = vpop.f32.mrb[15].mxu1  ;;  %v1364_v18 = vmul.f32 %v2236_v3, %v2236_v3 }
 0x4c8   :  { %v1362_v6 = vmul.f32 %v2238_v5, %v2238_v5 }
 0x54f   :  { %v1055_v16 = vpop.xlane.xlu1 %1054 }
 0x550   :  { %v1060_v52 = vmul.f32 0.0078125, %v1055_v16 }
 0x551   :  { %v1058_v2 = vpop.xlane.xlu0 %1057 }
 0x552   :  { %v1062_v53 = vmul.f32 %v1060_v52, %v1060_v52  ;;  %v1061_v54 = vmul.f32 0.0078125, %v1058_v2 }
 0x554   :  { %v1063_v55 = vsub.f32 %v1061_v54, %v1062_v53 }
 0x556   :  { %v1064_v60 = vmax.f32 %v1063_v55, 0.0 }
 0x558   :  { %v1065_v61 = vadd.f32 1e-05, %v1064_v60 }
 0x55a   :  { %1657 = vrsqrt.f32 %v1065_v61 }
 0x564   :  { %v1658_v50 = vpop.eup %1657 }
 0x565   :  { %v1067_v63 = vmul.f32 %v1658_v50, %v1052_v62 }
 0x567   :  { %1072 = vperm.xlu0 %1618, %v1067_v63   ;;  %v1068_v58 = vmul.f32 %v1067_v63, %v1060_v52 }
 0x569   :  { %v1069_v0 = vsub.f32 %v1053_v45, %v1068_v58 }
 0x56b   :  { %1078 = vperm.xlu1 %1617, %v1069_v0  }
 0x586   :  { %1359 = vadd.xlane.f32.xlu0 %v2236_v3 }
 0x58a   :  { %1367 = vadd.xlane.f32.xlu0 %v1362_v6 }
 0x58f   :  { %1353 = vadd.xlane.f32.xlu1 %v2233_v1 }
 0x593   :  { %1355 = vadd.xlane.f32.xlu1 %v2238_v5 }
 0x597   :  { %1357 = vadd.xlane.f32.xlu1 %v2231_v56 }
 0x59b   :  { %1365 = vadd.xlane.f32.xlu1 %v1361_v9 }
 0x5e6   :  { %v1073_v11 = vpop.permute.xlu0 %1072 }
 0x5e7   :  { %v1075_v12 = vmul.f32 %v1073_v11, %v1047_v46 }
 0x5ea   :  { %v1079_v13 = vpop.permute.xlu1 %1078 }
 0x5eb   :  { %v1081_v15 = vadd.f32 %v1079_v13, %v1075_v12 }
 0x5ed   :  { %v1082_v17 = vmax.f32 %v1081_v15, 0.0 }
 0x5ef   :  { %v1087_v19 = vpack.c.bf16 %v1082_v17, %v1082_v17 }
 0x5f1   :  { %1599 = vmatprep.subr.msk.bf16.mxu0 %vm617_vm9, %v1087_v19  ;;  %v1106_v20 = vsel %vm617_vm9, %v1087_v19, 0 }
 0x5f2   :  { %1588 = vmatpush3.bf16.msra.mxu0 %v1106_v20 }
 0x5f5   :  { %1590 = vmatmul.mubr.msk.bf16.vlgmr.msra.gmra.mrb[12].mxu0 %vm1098_vm11, %v1654_v22 }
 0x613   :  { %v1360_v25 = vpop.xlane.xlu0 %1359 }
 0x614   :  { %v2294_v55 = vmul.f32 0.0078125, %v1360_v25 }
 0x616   :  { %v1384_v45 = vmul.f32 %v2294_v55, %v2294_v55 }
 0x617   :  { %v1368_v4 = vpop.xlane.xlu0 %1367 }
 0x618   :  { %v1378_v34 = vmul.f32 0.0078125, %v1368_v4 }
 0x61c   :  { %v1354_v23 = vpop.xlane.xlu1 %1353 }
 0x61d   :  { %v2260_v29 = vmul.f32 0.0078125, %v1354_v23 }
 0x61f   :  { %v1381_v14 = vmul.f32 %v2260_v29, %v2260_v29 }
 0x620   :  { %v1356_v24 = vpop.xlane.xlu1 %1355 }
 0x621   :  { %v2255_v27 = vmul.f32 0.0078125, %v1356_v24 }
 0x623   :  { %v1382_v33 = vmul.f32 %v2255_v27, %v2255_v27 }
 0x624   :  { %v1358_v26 = vpop.xlane.xlu1 %1357 }
 0x625   :  { %v1386_v36 = vsub.f32 %v1378_v34, %v1382_v33  ;;  %v2306_v9 = vmul.f32 0.0078125, %v1358_v26 }
 0x627   :  { %v1390_v39 = vmax.f32 %v1386_v36, 0.0  ;;  %v1383_v25 = vmul.f32 %v2306_v9, %v2306_v9 }
 0x628   :  { %v1366_v31 = vpop.xlane.xlu1 %1365 }
 0x629   :  { %v1377_v35 = vmul.f32 0.0078125, %v1366_v31  ;;  %v1394_v42 = vadd.f32 1e-05, %v1390_v39 }
 0x62b   :  { %v1385_v37 = vsub.f32 %v1377_v35, %v1381_v14  ;;  %1659 = vrsqrt.f32 %v1394_v42 }
 0x62d   :  { %v1389_v40 = vmax.f32 %v1385_v37, 0.0 }
 0x62f   :  { %v1393_v43 = vadd.f32 1e-05, %v1389_v40 }
 0x631   :  { %1661 = vrsqrt.f32 %v1393_v43  ;;  %v1348_v43 = vld [vmem:[%s2404_s12 + $0x18] sm:$0xff] }
 0x635   :  { %v1660_v46 = vpop.eup %1659 }
 0x636   :  { %v1402_v49 = vmul.f32 %v1660_v46, %v1346_v47  ;;  %v1350_v47 = vld [vmem:[%s2405_s13 + $0x8] sm:$0xff] }
 0x63b   :  { %v1662_v59 = vpop.eup %1661 }
 0x63c   :  { %v2291_v8 = vmul.f32 %v1662_v59, %v1345_v48  ;;  %v1406_v59 = vmul.f32 %v1402_v49, %v2255_v27  ;;  %v1347_v48 = vld [vmem:[%s2404_s12 + $0x10] sm:$0xff] }
 0x63e   :  { %v1405_v27 = vmul.f32 %v2291_v8, %v2260_v29  ;;  %v1158_v29 = vld [vmem:[%s2401_s9 + $0x8] sm:$0xff] }
 0x6c8   :  { %v2253_v10 = vpop.f32.mrb[12].mxu0 }
 0x6c9   :  { %1169 = vadd.xlane.f32.xlu1 %v2253_v10  ;;  %v2258_v28 = vpop.f32.mrb[13].mxu0  ;;  %v1175_v38 = vmul.f32 %v2253_v10, %v2253_v10 }
 0x6ca   :  { %v2262_v30 = vpop.f32.mrb[14].mxu0  ;;  %v1173_v41 = vmul.f32 %v2258_v28, %v2258_v28 }
 0x6cb   :  { %v2264_v32 = vpop.f32.mrb[15].mxu0  ;;  %v1176_v21 = vmul.f32 %v2262_v30, %v2262_v30 }
 0x6cc   :  { %1167 = vadd.xlane.f32.xlu0 %v2264_v32  ;;  %v1174_v7 = vmul.f32 %v2264_v32, %v2264_v32 }
 0x6cd   :  { %1165 = vadd.xlane.f32.xlu1 %v2258_v28 }
 0x6d0   :  { %1183 = vadd.xlane.f32.xlu0 %v1176_v21 }
 0x6d1   :  { %1171 = vadd.xlane.f32.xlu1 %v2262_v30 }
 0x6d4   :  { %1179 = vadd.xlane.f32.xlu0 %v1174_v7 }
 0x6d5   :  { %1181 = vadd.xlane.f32.xlu1 %v1175_v38 }
 0x6d8   :  { %1371 = vadd.xlane.f32.xlu0 %v1364_v18 }
 0x6d9   :  { %1177 = vadd.xlane.f32.xlu1 %v1173_v41 }
 0x6dd   :  { %1369 = vadd.xlane.f32.xlu1 %v1363_v44 }
 0x6ee   :  { %1420 = vperm.xlu1 %1617, %v1402_v49   ;;  %1415 = vperm.xlu0 %1618, %v2291_v8   ;;  %v1349_v49 = vld [vmem:[%s2405_s13] sm:$0xff] }
 0x756   :  { %v1170_v51 = vpop.xlane.xlu1 %1169 }
 0x757   :  { %v2296_v60 = vmul.f32 0.0078125, %v1170_v51 }
 0x759   :  { %v1168_v16 = vpop.xlane.xlu0 %1167  ;;  %v1195_v58 = vmul.f32 %v2296_v60, %v2296_v60 }
 0x75a   :  { %v1166_v52 = vpop.xlane.xlu1 %1165  ;;  %v2308_v11 = vmul.f32 0.0078125, %v1168_v16  ;;  %v1410_v16 = vsub.f32 %v1350_v47, %v1406_v59 }
 0x75b   :  { %v2304_v0 = vmul.f32 0.0078125, %v1166_v52 }
 0x75c   :  { %v1194_v26 = vmul.f32 %v2308_v11, %v2308_v11 }
 0x75d   :  { %v1184_v2 = vpop.xlane.xlu0 %1183  ;;  %v1193_v22 = vmul.f32 %v2304_v0, %v2304_v0 }
 0x75e   :  { %v1172_v53 = vpop.xlane.xlu1 %1171  ;;  %v1192_v19 = vmul.f32 0.0078125, %v1184_v2 }
 0x75f   :  { %v2298_v62 = vmul.f32 0.0078125, %v1172_v53  ;;  %v1159_v53 = vld [vmem:[%s2401_s9 + $0x10] sm:$0xff] }
 0x761   :  { %v1180_v54 = vpop.xlane.xlu0 %1179  ;;  %v1196_v12 = vmul.f32 %v2298_v62, %v2298_v62 }
 0x762   :  { %v1182_v61 = vpop.xlane.xlu1 %1181  ;;  %v1190_v20 = vmul.f32 0.0078125, %v1180_v54 }
 0x763   :  { %v1191_v50 = vmul.f32 0.0078125, %v1182_v61  ;;  %v1200_v4 = vsub.f32 %v1192_v19, %v1196_v12 }
 0x764   :  { %v1198_v35 = vsub.f32 %v1190_v20, %v1194_v26  ;;  %v1164_v20 = vld [vmem:[%s2402_s10 + $0x18] sm:$0xff] }
 0x765   :  { %v1372_v63 = vpop.xlane.xlu0 %1371  ;;  %v1199_v13 = vsub.f32 %v1191_v50, %v1195_v58  ;;  %v1204_v36 = vmax.f32 %v1200_v4, 0.0  ;;  %v1157_v58 = vld [vmem:[%s2401_s9] sm:$0xff] }
 0x766   :  { %v1380_v57 = vmul.f32 0.0078125, %v1372_v63  ;;  %v1178_v6 = vpop.xlane.xlu1 %1177  ;;  %v1202_v39 = vmax.f32 %v1198_v35, 0.0  ;;  %v1160_v63 = vld [vmem:[%s2401_s9 + $0x18] sm:$0xff] }
 0x767   :  { %v1189_v17 = vmul.f32 0.0078125, %v1178_v6  ;;  %v1203_v33 = vmax.f32 %v1199_v13, 0.0  ;;  %v1208_v18 = vadd.f32 1e-05, %v1204_v36 }
 0x768   :  { %v1388_v15 = vsub.f32 %v1380_v57, %v1384_v45  ;;  %v1206_v42 = vadd.f32 1e-05, %v1202_v39  ;;  %v1409_v45 = vsub.f32 %v1349_v49, %v1405_v27 }
 0x769   :  { %v1197_v14 = vsub.f32 %v1189_v17, %v1193_v22  ;;  %v1207_v7 = vadd.f32 1e-05, %v1203_v33 }
 0x76a   :  { %v1392_v23 = vmax.f32 %v1388_v15, 0.0  ;;  %v1370_v24 = vpop.xlane.xlu1 %1369  ;;  %v1163_v15 = vld [vmem:[%s2402_s10 + $0x10] sm:$0xff] }
 0x76b   :  { %v1379_v31 = vmul.f32 0.0078125, %v1370_v24  ;;  %v1201_v38 = vmax.f32 %v1197_v14, 0.0 }
 0x76c   :  { %v1396_v34 = vadd.f32 1e-05, %v1392_v23 }
 0x76d   :  { %v1387_v21 = vsub.f32 %v1379_v31, %v1383_v25  ;;  %v1205_v41 = vadd.f32 1e-05, %v1201_v38  ;;  %v1416_v35 = vpop.permute.xlu0 %1415 }
 0x76e   :  { %1663 = vrsqrt.f32 %v1396_v34  ;;  %v1421_v14 = vpop.permute.xlu1 %1420 }
 0x76f   :  { %v1391_v37 = vmax.f32 %v1387_v21, 0.0  ;;  %v1434_v59 = vmul.f32 %v1421_v14, %v2238_v5 }
 0x771   :  { %v1395_v40 = vadd.f32 1e-05, %v1391_v37 }
 0x773   :  { %1665 = vrsqrt.f32 %v1395_v40 }
 0x774   :  { %1667 = vrsqrt.f32 %v1207_v7 }
 0x775   :  { %1669 = vrsqrt.f32 %v1208_v18  ;;  %v1433_v18 = vmul.f32 %v1416_v35, %v2233_v1 }
 0x776   :  { %1671 = vrsqrt.f32 %v1205_v41 }
 0x777   :  { %1673 = vrsqrt.f32 %v1206_v42 }
 0x778   :  { %v1664_v44 = vpop.eup %1663 }
 0x779   :  { %v1404_v46 = vmul.f32 %v1664_v44, %v1348_v43 }
 0x77b   :  { %1430 = vperm.xlu1 %1617, %v1404_v46   ;;  %v1408_v31 = vmul.f32 %v1404_v46, %v2294_v55 }
 0x77d   :  { %v1666_v51 = vpop.eup %1665 }
 0x77e   :  { %v1668_v52 = vpop.eup %1667  ;;  %v1403_v2 = vmul.f32 %v1666_v51, %v1347_v48 }
 0x77f   :  { %1444 = vperm.xlu1 %1617, %v1410_v16   ;;  %v1670_v54 = vpop.eup %1669  ;;  %v1215_v61 = vmul.f32 %v1668_v52, %v1159_v53 }
 0x780   :  { %1425 = vperm.xlu0 %1618, %v1403_v2   ;;  %v1672_v50 = vpop.eup %1671  ;;  %v1216_v8 = vmul.f32 %v1670_v54, %v1160_v63  ;;  %v1407_v26 = vmul.f32 %v1403_v2, %v2306_v9 }
 0x781   :  { %v1674_v57 = vpop.eup %1673  ;;  %v1213_v6 = vmul.f32 %v1672_v50, %v1157_v58  ;;  %v1219_v13 = vmul.f32 %v1215_v61, %v2296_v60  ;;  %v1161_v60 = vld [vmem:[%s2402_s10] sm:$0xff] }
 0x782   :  { %v1214_v12 = vmul.f32 %v1674_v57, %v1158_v29  ;;  %v1220_v17 = vmul.f32 %v1216_v8, %v2298_v62  ;;  %v1162_v62 = vld [vmem:[%s2402_s10 + $0x8] sm:$0xff]  ;;  %s1785_s10 = smov [#allocation8]  }
 0x783   :  { %1237 = vperm.xlu1 %1617, %v1215_v61   ;;  %v1223_v19 = vsub.f32 %v1163_v15, %v1219_v13  ;;  %v1217_v22 = vmul.f32 %v1213_v6, %v2304_v0  ;;  %v1351_v0 = vld [vmem:[%s2405_s13 + $0x10] sm:$0xff] }
 0x784   :  { %1439 = vperm.xlu0 %1618, %v1409_v45   ;;  %v1224_v23 = vsub.f32 %v1164_v20, %v1220_v17  ;;  %v1218_v24 = vmul.f32 %v1214_v12, %v2308_v11  ;;  %v1411_v33 = vsub.f32 %v1351_v0, %v1407_v26  ;;  %v1352_v11 = vld [vmem:[%s2405_s13 + $0x18] sm:$0xff]  ;;  %s1478_s13 = sshll.u32 %s1785_s10, 4  ;;  %s1479_s13 = int_to_ptr.vmem [resolvable:$true] %s1478_s13 }
 0x785   :  { %v1221_v25 = vsub.f32 %v1161_v60, %v1217_v22  ;;  %v1412_v34 = vsub.f32 %v1352_v11, %v1408_v31  ;;  %s1741_s26 = scalar_lea.vmem %s1479_s13, 512  ;;  %p1746_p11 = scmp.lt.s32.totalorder %s1479_s13, %s1479_s13 }
 0x786   :  { %v1222_v4 = vsub.f32 %v1162_v62, %v1218_v24  ;;  %p1742_p10 = scmp.ne.s32.totalorder %s1479_s13, %s1741_s26  ;;  %p1747_p12 = scmp.lt.s32.totalorder %s1741_s26, %s1741_s26 }
 0x787   :  { %1227 = vperm.xlu1 %1617, %v1213_v6  }
 0x788   :  { %1232 = vperm.xlu0 %1618, %v1214_v12   ;;  %p1748_p13 = por %p1747_p12, %p1746_p11 }
 0x78a   :  { %p1749_p0 = pnand %p1748_p13, %p1742_p10 }
 0x78b   :  { %1242 = vperm.xlu1 %1617, %v1216_v8  }
 0x78c   :  { %1261 = vperm.xlu0 %1618, %v1223_v19  }
 0x78f   :  { %1266 = vperm.xlu1 %1617, %v1224_v23  }
 0x790   :  { %1251 = vperm.xlu0 %1618, %v1221_v25  }
 0x793   :  { %1256 = vperm.xlu1 %1617, %v1222_v4  }
 0x794   :  { %1449 = vperm.xlu0 %1618, %v1411_v33  }
 0x797   :  { %1454 = vperm.xlu1 %1617, %v1412_v34  }
 0x7fa   :  { %v1431_v9 = vpop.permute.xlu1 %1430 }
 0x7fb   :  { %v1436_v54 = vmul.f32 %v2236_v3, %v1431_v9 }
 0x7fe   :  { %v1445_v21 = vpop.permute.xlu1 %1444 }
 0x7ff   :  { %v1426_v36 = vpop.permute.xlu0 %1425  ;;  %v1458_v2 = vadd.f32 %v1445_v21, %v1434_v59 }
 0x800   :  { %v1435_v48 = vmul.f32 %v2231_v56, %v1426_v36 }
 0x802   :  { %v1238_v37 = vpop.permute.xlu1 %1237 }
 0x803   :  { %v1440_v7 = vpop.permute.xlu0 %1439  ;;  %v1247_v51 = vmul.f32 %v2253_v10, %v1238_v37 }
 0x804   :  { %v1457_v44 = vadd.f32 %v1440_v7, %v1433_v18 }
 0x806   :  { %v1228_v38 = vpop.permute.xlu1 %1227 }
 0x807   :  { %v1233_v39 = vpop.permute.xlu0 %1232  ;;  %v1245_v41 = vmul.f32 %v1228_v38, %v2258_v28 }
 0x808   :  { %v1246_v47 = vmul.f32 %v1233_v39, %v2264_v32 }
 0x80a   :  { %v1243_v40 = vpop.permute.xlu1 %1242 }
 0x80b   :  { %v1262_v55 = vpop.permute.xlu0 %1261  ;;  %v1248_v61 = vmul.f32 %v2262_v30, %v1243_v40 }
 0x80c   :  { %v1271_v1 = vadd.f32 %v1262_v55, %v1247_v51 }
 0x80e   :  { %v1267_v42 = vpop.permute.xlu1 %1266 }
 0x80f   :  { %v1252_v43 = vpop.permute.xlu0 %1251  ;;  %v1272_v63 = vadd.f32 %v1267_v42, %v1248_v61 }
 0x810   :  { %v1269_v46 = vadd.f32 %v1252_v43, %v1245_v41 }
 0x812   :  { %v1461_v16 = vadd.f32 %v1457_v44, %v1269_v46  ;;  %v1257_v52 = vpop.permute.xlu1 %1256 }
 0x813   :  { %v1270_v53 = vadd.f32 %v1257_v52, %v1246_v47  ;;  %v1450_v27 = vpop.permute.xlu0 %1449 }
 0x814   :  { %v1465_v49 = vmax.f32 %v1461_v16, 0.0  ;;  %v1459_v28 = vadd.f32 %v1450_v27, %v1435_v48 }
 0x815   :  { %v1462_v50 = vadd.f32 %v1458_v2, %v1270_v53 }
 0x816   :  { %1469 = vst [vmem:[#allocation8] sm:$0xff] %v1465_v49  ;;  %v1463_v5 = vadd.f32 %v1459_v28, %v1271_v1  ;;  %v1455_v32 = vpop.permute.xlu1 %1454 }
 0x817   :  { %v1466_v56 = vmax.f32 %v1462_v50, 0.0  ;;  %v1460_v45 = vadd.f32 %v1455_v32, %v1436_v54 }
 0x818   :  { %v1467_v10 = vmax.f32 %v1463_v5, 0.0 }
 0x819   :  { %1470 = vst [vmem:[#allocation8 + $0x8] sm:$0xff] %v1466_v56  ;;  %v1464_v58 = vadd.f32 %v1460_v45, %v1272_v63 }
 0x81a   :  { %1471 = vst [vmem:[#allocation8 + $0x10] sm:$0xff] %v1467_v10 }
 0x81b   :  { %v1468_v57 = vmax.f32 %v1464_v58, 0.0 }
 0x81d   :  { %1472 = vst [vmem:[#allocation8 + $0x18] sm:$0xff] %v1468_v57 }
 0x81e   :  { %1752 = shalt.err (!%p1749_p0)
}
 0x81f   :  { %s1753_s2 = scalar_lea.hbm %s2408_s16, 512 }
 0x820   :  { %p1754_p1 = scmp.ne.s32.totalorder %s2408_s16, %s1753_s2  ;;  %p1757_p2 = scmp.lt.u32.totalorder %s1753_s2, %s2408_s16 }
 0x822   :  { %p1759_p3 = pnand %p1757_p2, %p1754_p1 }
 0x824   :  { %1762 = shalt.err (!%p1759_p3)
}
 0x825   :  { %1484 = dma.vmem_to_hbm [thread:$0]  %s1479_s13, 512, %s2408_s16, [#allocation4], %s1774_s24, %s1774_s24, %s1775_s18  }
 0x826   :  { %1767 = dma.done.wait [#allocation4], 512  }
 0x827   :  { %1768 = vsyncadd [#allocation4], 4294966784 }
 0x828   :  { %1488 = vsyncpa [#allocation3], 1 }
 0x829   :  { %1489 = vsyncpa [#allocation6], 1 }
 0x82a   :  { %1490 = vsyncpa [#allocation4], 1 }

</bundles_post_ra>
